<compile_context>
chip_gen: v7x
topology: tpu7x:2x2x1
jax: 0.10.0
libtpu: 0.0.40
codegen_flags: <defaults>
</compile_context>

<pallas_src>
import functools

import jax
import jax.numpy as jnp
from jax.experimental import pallas as pl
from jax.experimental.pallas import tpu as pltpu

INPUT_DIM = 134
HIDDEN_DIM = 20
NUM_CLASSES = 4

LANE = 128    # one gate per 128-lane block
BP = 8        # f32 sublane multiple -> batch padded to 8
D_PAD = 256   # input feature dim padded to a lane multiple


def _make_lstm_kernel(seq_len, b_pad, lane):
    """Kernel closure with static seq_len / padded-batch / lane-block sizes."""

    def kernel(x_ref, w_ih_ref, w_hh_ref, b_ref, w_fc_ref, b_fc_ref,
               out_ref, gx_ref):
        # ---- Prologue: ONE MXU call covers every step's input projection.
        # Parked in VMEM scratch (not an SSA value) so the unrolled recurrence
        # only keeps ~4 of its vregs live per step -> no regalloc spills.
        gx_ref[...] = (jnp.dot(x_ref[...], w_ih_ref[...],
                               preferred_element_type=jnp.float32)
                       + b_ref[...])                              # (S*BP, 4*LANE) f32

        # Recurrent weight load hoisted out of the time loop (stays resident).
        w_hh = w_hh_ref[...]                                      # (LANE, 4*LANE) bf16

        h = jnp.zeros((b_pad, lane), jnp.float32)
        c = jnp.zeros((b_pad, lane), jnp.float32)

        # ---- Serial recurrence, statically unrolled (S is small and static).
        # Padding lanes (cols >= H) carry zero weights/bias, so they stay 0.
        for t in range(seq_len):
            g_x = gx_ref[t * b_pad:(t + 1) * b_pad, :]            # static, sublane-aligned
            gates = g_x + jnp.dot(h.astype(jnp.bfloat16), w_hh,
                                  preferred_element_type=jnp.float32)
            # Lane-aligned gate views (each gate owns a full 128-lane block).
            i_g = jax.nn.sigmoid(gates[:, 0 * lane:1 * lane])
            f_g = jax.nn.sigmoid(gates[:, 1 * lane:2 * lane])
            g_g = jnp.tanh(gates[:, 2 * lane:3 * lane])
            o_g = jax.nn.sigmoid(gates[:, 3 * lane:4 * lane])
            c = f_g * c + i_g * g_g
            h = o_g * jnp.tanh(c)

        # ---- Fused classifier head on the final hidden state (dense 8x128 store).
        out_ref[...] = (jnp.dot(h.astype(jnp.bfloat16), w_fc_ref[...],
                                preferred_element_type=jnp.float32)
                        + b_fc_ref[...])

    return kernel


def pack_params(params):
    """One-time repack of PyTorch-layout params into the kernel layout.

    Call ONCE after loading weights; the per-call forward never touches the
    raw PyTorch-layout params again.
    """
    H = params["w_hh"].shape[1]          # weight_hh_l0: (4H, H)
    C = params["w_fc"].shape[0]          # fc.weight:    (C, H)
    D = params["w_ih"].shape[1]          # weight_ih_l0: (4H, D)
    assert H <= LANE and C <= LANE and D <= D_PAD

    # Lane-aligned gate packing: gate g lives in columns [g*LANE, g*LANE + H).
    def pack_gate_cols(w, rows_out=None):
        r = w.shape[0]
        blocks = [jnp.pad(w[:, g * H:(g + 1) * H], ((0, 0), (0, LANE - H)))
                  for g in range(4)]
        out = jnp.concatenate(blocks, axis=1)                     # (r, 4*LANE)
        if rows_out is not None and rows_out > r:
            out = jnp.pad(out, ((0, rows_out - r), (0, 0)))
        return out

    w_ih_p = pack_gate_cols(params["w_ih"].T,
                            rows_out=D_PAD).astype(jnp.bfloat16)              # (D_PAD, 4*LANE)
    w_hh_p = pack_gate_cols(params["w_hh"].T,
                            rows_out=LANE).astype(jnp.bfloat16)               # (LANE, 4*LANE)
    b_p = pack_gate_cols((params["b_ih"] + params["b_hh"]).reshape(1, 4 * H)) # (1, 4*LANE) f32
    w_fc_p = jnp.pad(params["w_fc"].T,
                     ((0, LANE - H), (0, LANE - C))).astype(jnp.bfloat16)     # (LANE, LANE)
    b_fc_p = jnp.pad(params["b_fc"].reshape(1, C),
                     ((0, 0), (0, LANE - C)))                                 # (1, LANE) f32

    return {"w_ih_p": w_ih_p, "w_hh_p": w_hh_p, "b_p": b_p,
            "w_fc_p": w_fc_p, "b_fc_p": b_fc_p}


@functools.partial(jax.jit, static_argnames=("num_classes",))
def lstm_classifier_forward(x, packed, num_classes=NUM_CLASSES):
    """x: (B, S, D) float32, packed: output of pack_params.
    Returns logits (B, num_classes) float32."""
    B, S, D = x.shape
    assert B <= BP and D <= D_PAD

    # Time-major, batch padded to BP, feature dim padded to D_PAD, flattened so
    # one MXU call covers all steps.
    x_tm = jnp.transpose(x, (1, 0, 2))                            # (S, B, D)
    x_tm = jnp.pad(x_tm, ((0, 0), (0, BP - B), (0, D_PAD - D)))   # (S, BP, D_PAD)
    x2d = x_tm.reshape(S * BP, D_PAD).astype(jnp.bfloat16)        # (S*BP, D_PAD)

    out_p = pl.pallas_call(
        _make_lstm_kernel(S, BP, LANE),
        out_shape=jax.ShapeDtypeStruct((BP, LANE), jnp.float32),
        scratch_shapes=[pltpu.VMEM((S * BP, 4 * LANE), jnp.float32)],  # gates_x
    )(x2d, packed["w_ih_p"], packed["w_hh_p"], packed["b_p"],
      packed["w_fc_p"], packed["b_fc_p"])

    return out_p[:B, :num_classes]


def init_params(key, input_dim=INPUT_DIM, hidden_dim=HIDDEN_DIM, num_classes=NUM_CLASSES):
    """Deterministic synthetic init matching nn.LSTM / nn.Linear parameter shapes."""
    ks = jax.random.split(key, 6)
    k = 1.0 / jnp.sqrt(hidden_dim)
    u = lambda kk, shape: jax.random.uniform(kk, shape, jnp.float32, -k, k)
    return {
        "w_ih": u(ks[0], (4 * hidden_dim, input_dim)),   # weight_ih_l0
        "w_hh": u(ks[1], (4 * hidden_dim, hidden_dim)),  # weight_hh_l0
        "b_ih": u(ks[2], (4 * hidden_dim,)),             # bias_ih_l0
        "b_hh": u(ks[3], (4 * hidden_dim,)),             # bias_hh_l0
        "w_fc": u(ks[4], (num_classes, hidden_dim)),     # fc.weight
        "b_fc": u(ks[5], (num_classes,)),                # fc.bias
    }


def reference_forward(x, params):
    """Pure-JAX f32 reference of the PyTorch forward, for verification."""
    B, S, D = x.shape
    H = params["w_hh"].shape[1]
    h = jnp.zeros((B, H), jnp.float32)
    c = jnp.zeros((B, H), jnp.float32)

    def step(carry, x_t):
        h, c = carry
        gates = (x_t @ params["w_ih"].T + h @ params["w_hh"].T
                 + params["b_ih"] + params["b_hh"])
        i_g = jax.nn.sigmoid(gates[:, 0 * H:1 * H])
        f_g = jax.nn.sigmoid(gates[:, 1 * H:2 * H])
        g_g = jnp.tanh(gates[:, 2 * H:3 * H])
        o_g = jax.nn.sigmoid(gates[:, 3 * H:4 * H])
        c = f_g * c + i_g * g_g
        h = o_g * jnp.tanh(c)
        return (h, c), None

    (h, c), _ = jax.lax.scan(step, (h, c), jnp.transpose(x, (1, 0, 2)))
    return h @ params["w_fc"].T + params["b_fc"]


if __name__ == "__main__":
    key = jax.random.PRNGKey(0)
    k_param, k_x = jax.random.split(key)

    B, S = 2, 8
    params = init_params(k_param)
    packed = pack_params(params)                    # one-time prep, NOT per-call
    x = jax.random.normal(k_x, (B, S, INPUT_DIM), jnp.float32)

    out = lstm_classifier_forward(x, packed)
    out = jax.block_until_ready(out)

    ref = reference_forward(x, params)
    assert out.shape == (B, NUM_CLASSES)
    # bf16 MXU operands (f32 accumulation) -> ~1e-2-level agreement with the f32 reference.
    assert jnp.allclose(out, ref, atol=5e-2, rtol=5e-2), (out, ref)

    print("KERNEL_OK")
</pallas_src>

<mosaic_0001>
module attributes {stable_mosaic.version = 11 : i64} {
  func.func @kernel(%arg0: memref<64x256xbf16, #tpu.memory_space<vmem>>, %arg1: memref<256x512xbf16, #tpu.memory_space<vmem>>, %arg2: memref<128x512xbf16, #tpu.memory_space<vmem>>, %arg3: memref<1x512xf32, #tpu.memory_space<vmem>>, %arg4: memref<128x128xbf16, #tpu.memory_space<vmem>>, %arg5: memref<1x128xf32, #tpu.memory_space<vmem>>, %arg6: memref<8x128xf32, #tpu.memory_space<vmem>>, %arg7: memref<64x512xf32, #tpu.memory_space<vmem>>) attributes {dimension_semantics = [], scalar_prefetch = 0 : i64, scratch_operands = 1 : i64, tpu.core_type = #tpu.core_type<tc>} {
    %c0 = arith.constant 0 : index
    %c0_0 = arith.constant 0 : index
    %0 = vector.load %arg0[%c0, %c0_0] : memref<64x256xbf16, #tpu.memory_space<vmem>>, vector<64x256xbf16>
    %c0_1 = arith.constant 0 : index
    %c0_2 = arith.constant 0 : index
    %1 = vector.load %arg1[%c0_1, %c0_2] : memref<256x512xbf16, #tpu.memory_space<vmem>>, vector<256x512xbf16>
    %cst = arith.constant dense<0.000000e+00> : vector<64x512xf32>
    %2 = tpu.matmul %0, %1, %cst {dimension_numbers = #tpu.dot_dimension_numbers<[1], [0], [0], [1], [0, 0, 1, 1], [], []>} : vector<64x256xbf16>, vector<256x512xbf16>, vector<64x512xf32> -> vector<64x512xf32>
    %c0_3 = arith.constant 0 : index
    %c0_4 = arith.constant 0 : index
    %3 = vector.load %arg3[%c0_3, %c0_4] : memref<1x512xf32, #tpu.memory_space<vmem>>, vector<1x512xf32>
    %4 = vector.broadcast %3 : vector<1x512xf32> to vector<64x512xf32>
    %5 = arith.addf %2, %4 : vector<64x512xf32>
    %c0_5 = arith.constant 0 : index
    %c0_6 = arith.constant 0 : index
    %6 = vector.load %arg7[%c0_5, %c0_6] : memref<64x512xf32, #tpu.memory_space<vmem>>, vector<64x512xf32>
    tpu.vector_store %arg7[%c0_5, %c0_6], %5 {strides = array<i32>} : memref<64x512xf32, #tpu.memory_space<vmem>>, vector<64x512xf32>,
    %c0_7 = arith.constant 0 : index
    %c0_8 = arith.constant 0 : index
    %7 = vector.load %arg2[%c0_7, %c0_8] : memref<128x512xbf16, #tpu.memory_space<vmem>>, vector<128x512xbf16>
    %cst_9 = arith.constant 0.000000e+00 : f32
    %8 = vector.broadcast %cst_9 : f32 to vector<8x128xf32>
    %cst_10 = arith.constant 0.000000e+00 : f32
    %9 = vector.broadcast %cst_10 : f32 to vector<8x128xf32>
    %c0_11 = arith.constant 0 : index
    %c0_12 = arith.constant 0 : index
    %10 = vector.load %arg7[%c0_11, %c0_12] : memref<64x512xf32, #tpu.memory_space<vmem>>, vector<8x512xf32>
    %11 = arith.truncf %8 : vector<8x128xf32> to vector<8x128xbf16>
    %cst_13 = arith.constant dense<0.000000e+00> : vector<8x512xf32>
    %12 = tpu.matmul %11, %7, %cst_13 {dimension_numbers = #tpu.dot_dimension_numbers<[1], [0], [0], [1], [0, 0, 1, 1], [], []>} : vector<8x128xbf16>, vector<128x512xbf16>, vector<8x512xf32> -> vector<8x512xf32>
    %13 = arith.addf %10, %12 : vector<8x512xf32>
    %14 = vector.extract_strided_slice %13 {offsets = [0, 0], sizes = [8, 128], strides = [1, 1]} : vector<8x512xf32> to vector<8x128xf32>
    %15 = arith.negf %14 : vector<8x128xf32>
    %16 = math.exp %15 : vector<8x128xf32>
    %cst_14 = arith.constant 1.000000e+00 : f32
    %17 = vector.broadcast %cst_14 : f32 to vector<8x128xf32>
    %18 = arith.addf %17, %16 : vector<8x128xf32>
    %19 = arith.divf %17, %18 : vector<8x128xf32>
    %20 = vector.extract_strided_slice %13 {offsets = [0, 128], sizes = [8, 128], strides = [1, 1]} : vector<8x512xf32> to vector<8x128xf32>
    %21 = arith.negf %20 : vector<8x128xf32>
    %22 = math.exp %21 : vector<8x128xf32>
    %cst_15 = arith.constant 1.000000e+00 : f32
    %23 = vector.broadcast %cst_15 : f32 to vector<8x128xf32>
    %24 = arith.addf %23, %22 : vector<8x128xf32>
    %25 = arith.divf %23, %24 : vector<8x128xf32>
    %26 = vector.extract_strided_slice %13 {offsets = [0, 256], sizes = [8, 128], strides = [1, 1]} : vector<8x512xf32> to vector<8x128xf32>
    %27 = math.tanh %26 : vector<8x128xf32>
    %28 = vector.extract_strided_slice %13 {offsets = [0, 384], sizes = [8, 128], strides = [1, 1]} : vector<8x512xf32> to vector<8x128xf32>
    %29 = arith.negf %28 : vector<8x128xf32>
    %30 = math.exp %29 : vector<8x128xf32>
    %cst_16 = arith.constant 1.000000e+00 : f32
    %31 = vector.broadcast %cst_16 : f32 to vector<8x128xf32>
    %32 = arith.addf %31, %30 : vector<8x128xf32>
    %33 = arith.divf %31, %32 : vector<8x128xf32>
    %34 = arith.mulf %25, %9 : vector<8x128xf32>
    %35 = arith.mulf %19, %27 : vector<8x128xf32>
    %36 = arith.addf %34, %35 : vector<8x128xf32>
    %37 = math.tanh %36 : vector<8x128xf32>
    %38 = arith.mulf %33, %37 : vector<8x128xf32>
    %c8 = arith.constant 8 : index
    %c0_17 = arith.constant 0 : index
    %39 = vector.load %arg7[%c8, %c0_17] : memref<64x512xf32, #tpu.memory_space<vmem>>, vector<8x512xf32>
    %40 = arith.truncf %38 : vector<8x128xf32> to vector<8x128xbf16>
    %cst_18 = arith.constant dense<0.000000e+00> : vector<8x512xf32>
    %41 = tpu.matmul %40, %7, %cst_18 {dimension_numbers = #tpu.dot_dimension_numbers<[1], [0], [0], [1], [0, 0, 1, 1], [], []>} : vector<8x128xbf16>, vector<128x512xbf16>, vector<8x512xf32> -> vector<8x512xf32>
    %42 = arith.addf %39, %41 : vector<8x512xf32>
    %43 = vector.extract_strided_slice %42 {offsets = [0, 0], sizes = [8, 128], strides = [1, 1]} : vector<8x512xf32> to vector<8x128xf32>
    %44 = arith.negf %43 : vector<8x128xf32>
    %45 = math.exp %44 : vector<8x128xf32>
    %cst_19 = arith.constant 1.000000e+00 : f32
    %46 = vector.broadcast %cst_19 : f32 to vector<8x128xf32>
    %47 = arith.addf %46, %45 : vector<8x128xf32>
    %48 = arith.divf %46, %47 : vector<8x128xf32>
    %49 = vector.extract_strided_slice %42 {offsets = [0, 128], sizes = [8, 128], strides = [1, 1]} : vector<8x512xf32> to vector<8x128xf32>
    %50 = arith.negf %49 : vector<8x128xf32>
    %51 = math.exp %50 : vector<8x128xf32>
    %cst_20 = arith.constant 1.000000e+00 : f32
    %52 = vector.broadcast %cst_20 : f32 to vector<8x128xf32>
    %53 = arith.addf %52, %51 : vector<8x128xf32>
    %54 = arith.divf %52, %53 : vector<8x128xf32>
    %55 = vector.extract_strided_slice %42 {offsets = [0, 256], sizes = [8, 128], strides = [1, 1]} : vector<8x512xf32> to vector<8x128xf32>
    %56 = math.tanh %55 : vector<8x128xf32>
    %57 = vector.extract_strided_slice %42 {offsets = [0, 384], sizes = [8, 128], strides = [1, 1]} : vector<8x512xf32> to vector<8x128xf32>
    %58 = arith.negf %57 : vector<8x128xf32>
    %59 = math.exp %58 : vector<8x128xf32>
    %cst_21 = arith.constant 1.000000e+00 : f32
    %60 = vector.broadcast %cst_21 : f32 to vector<8x128xf32>
    %61 = arith.addf %60, %59 : vector<8x128xf32>
    %62 = arith.divf %60, %61 : vector<8x128xf32>
    %63 = arith.mulf %54, %36 : vector<8x128xf32>
    %64 = arith.mulf %48, %56 : vector<8x128xf32>
    %65 = arith.addf %63, %64 : vector<8x128xf32>
    %66 = math.tanh %65 : vector<8x128xf32>
    %67 = arith.mulf %62, %66 : vector<8x128xf32>
    %c16 = arith.constant 16 : index
    %c0_22 = arith.constant 0 : index
    %68 = vector.load %arg7[%c16, %c0_22] : memref<64x512xf32, #tpu.memory_space<vmem>>, vector<8x512xf32>
    %69 = arith.truncf %67 : vector<8x128xf32> to vector<8x128xbf16>
    %cst_23 = arith.constant dense<0.000000e+00> : vector<8x512xf32>
    %70 = tpu.matmul %69, %7, %cst_23 {dimension_numbers = #tpu.dot_dimension_numbers<[1], [0], [0], [1], [0, 0, 1, 1], [], []>} : vector<8x128xbf16>, vector<128x512xbf16>, vector<8x512xf32> -> vector<8x512xf32>
    %71 = arith.addf %68, %70 : vector<8x512xf32>
    %72 = vector.extract_strided_slice %71 {offsets = [0, 0], sizes = [8, 128], strides = [1, 1]} : vector<8x512xf32> to vector<8x128xf32>
    %73 = arith.negf %72 : vector<8x128xf32>
    %74 = math.exp %73 : vector<8x128xf32>
    %cst_24 = arith.constant 1.000000e+00 : f32
    %75 = vector.broadcast %cst_24 : f32 to vector<8x128xf32>
    %76 = arith.addf %75, %74 : vector<8x128xf32>
    %77 = arith.divf %75, %76 : vector<8x128xf32>
    %78 = vector.extract_strided_slice %71 {offsets = [0, 128], sizes = [8, 128], strides = [1, 1]} : vector<8x512xf32> to vector<8x128xf32>
    %79 = arith.negf %78 : vector<8x128xf32>
    %80 = math.exp %79 : vector<8x128xf32>
    %cst_25 = arith.constant 1.000000e+00 : f32
    %81 = vector.broadcast %cst_25 : f32 to vector<8x128xf32>
    %82 = arith.addf %81, %80 : vector<8x128xf32>
    %83 = arith.divf %81, %82 : vector<8x128xf32>
    %84 = vector.extract_strided_slice %71 {offsets = [0, 256], sizes = [8, 128], strides = [1, 1]} : vector<8x512xf32> to vector<8x128xf32>
    %85 = math.tanh %84 : vector<8x128xf32>
    %86 = vector.extract_strided_slice %71 {offsets = [0, 384], sizes = [8, 128], strides = [1, 1]} : vector<8x512xf32> to vector<8x128xf32>
    %87 = arith.negf %86 : vector<8x128xf32>
    %88 = math.exp %87 : vector<8x128xf32>
    %cst_26 = arith.constant 1.000000e+00 : f32
    %89 = vector.broadcast %cst_26 : f32 to vector<8x128xf32>
    %90 = arith.addf %89, %88 : vector<8x128xf32>
    %91 = arith.divf %89, %90 : vector<8x128xf32>
    %92 = arith.mulf %83, %65 : vector<8x128xf32>
    %93 = arith.mulf %77, %85 : vector<8x128xf32>
    %94 = arith.addf %92, %93 : vector<8x128xf32>
    %95 = math.tanh %94 : vector<8x128xf32>
    %96 = arith.mulf %91, %95 : vector<8x128xf32>
    %c24 = arith.constant 24 : index
    %c0_27 = arith.constant 0 : index
    %97 = vector.load %arg7[%c24, %c0_27] : memref<64x512xf32, #tpu.memory_space<vmem>>, vector<8x512xf32>
    %98 = arith.truncf %96 : vector<8x128xf32> to vector<8x128xbf16>
    %cst_28 = arith.constant dense<0.000000e+00> : vector<8x512xf32>
    %99 = tpu.matmul %98, %7, %cst_28 {dimension_numbers = #tpu.dot_dimension_numbers<[1], [0], [0], [1], [0, 0, 1, 1], [], []>} : vector<8x128xbf16>, vector<128x512xbf16>, vector<8x512xf32> -> vector<8x512xf32>
    %100 = arith.addf %97, %99 : vector<8x512xf32>
    %101 = vector.extract_strided_slice %100 {offsets = [0, 0], sizes = [8, 128], strides = [1, 1]} : vector<8x512xf32> to vector<8x128xf32>
    %102 = arith.negf %101 : vector<8x128xf32>
    %103 = math.exp %102 : vector<8x128xf32>
    %cst_29 = arith.constant 1.000000e+00 : f32
    %104 = vector.broadcast %cst_29 : f32 to vector<8x128xf32>
    %105 = arith.addf %104, %103 : vector<8x128xf32>
    %106 = arith.divf %104, %105 : vector<8x128xf32>
    %107 = vector.extract_strided_slice %100 {offsets = [0, 128], sizes = [8, 128], strides = [1, 1]} : vector<8x512xf32> to vector<8x128xf32>
    %108 = arith.negf %107 : vector<8x128xf32>
    %109 = math.exp %108 : vector<8x128xf32>
    %cst_30 = arith.constant 1.000000e+00 : f32
    %110 = vector.broadcast %cst_30 : f32 to vector<8x128xf32>
    %111 = arith.addf %110, %109 : vector<8x128xf32>
    %112 = arith.divf %110, %111 : vector<8x128xf32>
    %113 = vector.extract_strided_slice %100 {offsets = [0, 256], sizes = [8, 128], strides = [1, 1]} : vector<8x512xf32> to vector<8x128xf32>
    %114 = math.tanh %113 : vector<8x128xf32>
    %115 = vector.extract_strided_slice %100 {offsets = [0, 384], sizes = [8, 128], strides = [1, 1]} : vector<8x512xf32> to vector<8x128xf32>
    %116 = arith.negf %115 : vector<8x128xf32>
    %117 = math.exp %116 : vector<8x128xf32>
    %cst_31 = arith.constant 1.000000e+00 : f32
    %118 = vector.broadcast %cst_31 : f32 to vector<8x128xf32>
    %119 = arith.addf %118, %117 : vector<8x128xf32>
    %120 = arith.divf %118, %119 : vector<8x128xf32>
    %121 = arith.mulf %112, %94 : vector<8x128xf32>
    %122 = arith.mulf %106, %114 : vector<8x128xf32>
    %123 = arith.addf %121, %122 : vector<8x128xf32>
    %124 = math.tanh %123 : vector<8x128xf32>
    %125 = arith.mulf %120, %124 : vector<8x128xf32>
    %c32 = arith.constant 32 : index
    %c0_32 = arith.constant 0 : index
    %126 = vector.load %arg7[%c32, %c0_32] : memref<64x512xf32, #tpu.memory_space<vmem>>, vector<8x512xf32>
    %127 = arith.truncf %125 : vector<8x128xf32> to vector<8x128xbf16>
    %cst_33 = arith.constant dense<0.000000e+00> : vector<8x512xf32>
    %128 = tpu.matmul %127, %7, %cst_33 {dimension_numbers = #tpu.dot_dimension_numbers<[1], [0], [0], [1], [0, 0, 1, 1], [], []>} : vector<8x128xbf16>, vector<128x512xbf16>, vector<8x512xf32> -> vector<8x512xf32>
    %129 = arith.addf %126, %128 : vector<8x512xf32>
    %130 = vector.extract_strided_slice %129 {offsets = [0, 0], sizes = [8, 128], strides = [1, 1]} : vector<8x512xf32> to vector<8x128xf32>
    %131 = arith.negf %130 : vector<8x128xf32>
    %132 = math.exp %131 : vector<8x128xf32>
    %cst_34 = arith.constant 1.000000e+00 : f32
    %133 = vector.broadcast %cst_34 : f32 to vector<8x128xf32>
    %134 = arith.addf %133, %132 : vector<8x128xf32>
    %135 = arith.divf %133, %134 : vector<8x128xf32>
    %136 = vector.extract_strided_slice %129 {offsets = [0, 128], sizes = [8, 128], strides = [1, 1]} : vector<8x512xf32> to vector<8x128xf32>
    %137 = arith.negf %136 : vector<8x128xf32>
    %138 = math.exp %137 : vector<8x128xf32>
    %cst_35 = arith.constant 1.000000e+00 : f32
    %139 = vector.broadcast %cst_35 : f32 to vector<8x128xf32>
    %140 = arith.addf %139, %138 : vector<8x128xf32>
    %141 = arith.divf %139, %140 : vector<8x128xf32>
    %142 = vector.extract_strided_slice %129 {offsets = [0, 256], sizes = [8, 128], strides = [1, 1]} : vector<8x512xf32> to vector<8x128xf32>
    %143 = math.tanh %142 : vector<8x128xf32>
    %144 = vector.extract_strided_slice %129 {offsets = [0, 384], sizes = [8, 128], strides = [1, 1]} : vector<8x512xf32> to vector<8x128xf32>
    %145 = arith.negf %144 : vector<8x128xf32>
    %146 = math.exp %145 : vector<8x128xf32>
    %cst_36 = arith.constant 1.000000e+00 : f32
    %147 = vector.broadcast %cst_36 : f32 to vector<8x128xf32>
    %148 = arith.addf %147, %146 : vector<8x128xf32>
    %149 = arith.divf %147, %148 : vector<8x128xf32>
    %150 = arith.mulf %141, %123 : vector<8x128xf32>
    %151 = arith.mulf %135, %143 : vector<8x128xf32>
    %152 = arith.addf %150, %151 : vector<8x128xf32>
    %153 = math.tanh %152 : vector<8x128xf32>
    %154 = arith.mulf %149, %153 : vector<8x128xf32>
    %c40 = arith.constant 40 : index
    %c0_37 = arith.constant 0 : index
    %155 = vector.load %arg7[%c40, %c0_37] : memref<64x512xf32, #tpu.memory_space<vmem>>, vector<8x512xf32>
    %156 = arith.truncf %154 : vector<8x128xf32> to vector<8x128xbf16>
    %cst_38 = arith.constant dense<0.000000e+00> : vector<8x512xf32>
    %157 = tpu.matmul %156, %7, %cst_38 {dimension_numbers = #tpu.dot_dimension_numbers<[1], [0], [0], [1], [0, 0, 1, 1], [], []>} : vector<8x128xbf16>, vector<128x512xbf16>, vector<8x512xf32> -> vector<8x512xf32>
    %158 = arith.addf %155, %157 : vector<8x512xf32>
    %159 = vector.extract_strided_slice %158 {offsets = [0, 0], sizes = [8, 128], strides = [1, 1]} : vector<8x512xf32> to vector<8x128xf32>
    %160 = arith.negf %159 : vector<8x128xf32>
    %161 = math.exp %160 : vector<8x128xf32>
    %cst_39 = arith.constant 1.000000e+00 : f32
    %162 = vector.broadcast %cst_39 : f32 to vector<8x128xf32>
    %163 = arith.addf %162, %161 : vector<8x128xf32>
    %164 = arith.divf %162, %163 : vector<8x128xf32>
    %165 = vector.extract_strided_slice %158 {offsets = [0, 128], sizes = [8, 128], strides = [1, 1]} : vector<8x512xf32> to vector<8x128xf32>
    %166 = arith.negf %165 : vector<8x128xf32>
    %167 = math.exp %166 : vector<8x128xf32>
    %cst_40 = arith.constant 1.000000e+00 : f32
    %168 = vector.broadcast %cst_40 : f32 to vector<8x128xf32>
    %169 = arith.addf %168, %167 : vector<8x128xf32>
    %170 = arith.divf %168, %169 : vector<8x128xf32>
    %171 = vector.extract_strided_slice %158 {offsets = [0, 256], sizes = [8, 128], strides = [1, 1]} : vector<8x512xf32> to vector<8x128xf32>
    %172 = math.tanh %171 : vector<8x128xf32>
    %173 = vector.extract_strided_slice %158 {offsets = [0, 384], sizes = [8, 128], strides = [1, 1]} : vector<8x512xf32> to vector<8x128xf32>
    %174 = arith.negf %173 : vector<8x128xf32>
    %175 = math.exp %174 : vector<8x128xf32>
    %cst_41 = arith.constant 1.000000e+00 : f32
    %176 = vector.broadcast %cst_41 : f32 to vector<8x128xf32>
    %177 = arith.addf %176, %175 : vector<8x128xf32>
    %178 = arith.divf %176, %177 : vector<8x128xf32>
    %179 = arith.mulf %170, %152 : vector<8x128xf32>
    %180 = arith.mulf %164, %172 : vector<8x128xf32>
    %181 = arith.addf %179, %180 : vector<8x128xf32>
    %182 = math.tanh %181 : vector<8x128xf32>
    %183 = arith.mulf %178, %182 : vector<8x128xf32>
    %c48 = arith.constant 48 : index
    %c0_42 = arith.constant 0 : index
    %184 = vector.load %arg7[%c48, %c0_42] : memref<64x512xf32, #tpu.memory_space<vmem>>, vector<8x512xf32>
    %185 = arith.truncf %183 : vector<8x128xf32> to vector<8x128xbf16>
    %cst_43 = arith.constant dense<0.000000e+00> : vector<8x512xf32>
    %186 = tpu.matmul %185, %7, %cst_43 {dimension_numbers = #tpu.dot_dimension_numbers<[1], [0], [0], [1], [0, 0, 1, 1], [], []>} : vector<8x128xbf16>, vector<128x512xbf16>, vector<8x512xf32> -> vector<8x512xf32>
    %187 = arith.addf %184, %186 : vector<8x512xf32>
    %188 = vector.extract_strided_slice %187 {offsets = [0, 0], sizes = [8, 128], strides = [1, 1]} : vector<8x512xf32> to vector<8x128xf32>
    %189 = arith.negf %188 : vector<8x128xf32>
    %190 = math.exp %189 : vector<8x128xf32>
    %cst_44 = arith.constant 1.000000e+00 : f32
    %191 = vector.broadcast %cst_44 : f32 to vector<8x128xf32>
    %192 = arith.addf %191, %190 : vector<8x128xf32>
    %193 = arith.divf %191, %192 : vector<8x128xf32>
    %194 = vector.extract_strided_slice %187 {offsets = [0, 128], sizes = [8, 128], strides = [1, 1]} : vector<8x512xf32> to vector<8x128xf32>
    %195 = arith.negf %194 : vector<8x128xf32>
    %196 = math.exp %195 : vector<8x128xf32>
    %cst_45 = arith.constant 1.000000e+00 : f32
    %197 = vector.broadcast %cst_45 : f32 to vector<8x128xf32>
    %198 = arith.addf %197, %196 : vector<8x128xf32>
    %199 = arith.divf %197, %198 : vector<8x128xf32>
    %200 = vector.extract_strided_slice %187 {offsets = [0, 256], sizes = [8, 128], strides = [1, 1]} : vector<8x512xf32> to vector<8x128xf32>
    %201 = math.tanh %200 : vector<8x128xf32>
    %202 = vector.extract_strided_slice %187 {offsets = [0, 384], sizes = [8, 128], strides = [1, 1]} : vector<8x512xf32> to vector<8x128xf32>
    %203 = arith.negf %202 : vector<8x128xf32>
    %204 = math.exp %203 : vector<8x128xf32>
    %cst_46 = arith.constant 1.000000e+00 : f32
    %205 = vector.broadcast %cst_46 : f32 to vector<8x128xf32>
    %206 = arith.addf %205, %204 : vector<8x128xf32>
    %207 = arith.divf %205, %206 : vector<8x128xf32>
    %208 = arith.mulf %199, %181 : vector<8x128xf32>
    %209 = arith.mulf %193, %201 : vector<8x128xf32>
    %210 = arith.addf %208, %209 : vector<8x128xf32>
    %211 = math.tanh %210 : vector<8x128xf32>
    %212 = arith.mulf %207, %211 : vector<8x128xf32>
    %c56 = arith.constant 56 : index
    %c0_47 = arith.constant 0 : index
    %213 = vector.load %arg7[%c56, %c0_47] : memref<64x512xf32, #tpu.memory_space<vmem>>, vector<8x512xf32>
    %214 = arith.truncf %212 : vector<8x128xf32> to vector<8x128xbf16>
    %cst_48 = arith.constant dense<0.000000e+00> : vector<8x512xf32>
    %215 = tpu.matmul %214, %7, %cst_48 {dimension_numbers = #tpu.dot_dimension_numbers<[1], [0], [0], [1], [0, 0, 1, 1], [], []>} : vector<8x128xbf16>, vector<128x512xbf16>, vector<8x512xf32> -> vector<8x512xf32>
    %216 = arith.addf %213, %215 : vector<8x512xf32>
    %217 = vector.extract_strided_slice %216 {offsets = [0, 0], sizes = [8, 128], strides = [1, 1]} : vector<8x512xf32> to vector<8x128xf32>
    %218 = arith.negf %217 : vector<8x128xf32>
    %219 = math.exp %218 : vector<8x128xf32>
    %cst_49 = arith.constant 1.000000e+00 : f32
    %220 = vector.broadcast %cst_49 : f32 to vector<8x128xf32>
    %221 = arith.addf %220, %219 : vector<8x128xf32>
    %222 = arith.divf %220, %221 : vector<8x128xf32>
    %223 = vector.extract_strided_slice %216 {offsets = [0, 128], sizes = [8, 128], strides = [1, 1]} : vector<8x512xf32> to vector<8x128xf32>
    %224 = arith.negf %223 : vector<8x128xf32>
    %225 = math.exp %224 : vector<8x128xf32>
    %cst_50 = arith.constant 1.000000e+00 : f32
    %226 = vector.broadcast %cst_50 : f32 to vector<8x128xf32>
    %227 = arith.addf %226, %225 : vector<8x128xf32>
    %228 = arith.divf %226, %227 : vector<8x128xf32>
    %229 = vector.extract_strided_slice %216 {offsets = [0, 256], sizes = [8, 128], strides = [1, 1]} : vector<8x512xf32> to vector<8x128xf32>
    %230 = math.tanh %229 : vector<8x128xf32>
    %231 = vector.extract_strided_slice %216 {offsets = [0, 384], sizes = [8, 128], strides = [1, 1]} : vector<8x512xf32> to vector<8x128xf32>
    %232 = arith.negf %231 : vector<8x128xf32>
    %233 = math.exp %232 : vector<8x128xf32>
    %cst_51 = arith.constant 1.000000e+00 : f32
    %234 = vector.broadcast %cst_51 : f32 to vector<8x128xf32>
    %235 = arith.addf %234, %233 : vector<8x128xf32>
    %236 = arith.divf %234, %235 : vector<8x128xf32>
    %237 = arith.mulf %228, %210 : vector<8x128xf32>
    %238 = arith.mulf %222, %230 : vector<8x128xf32>
    %239 = arith.addf %237, %238 : vector<8x128xf32>
    %240 = math.tanh %239 : vector<8x128xf32>
    %241 = arith.mulf %236, %240 : vector<8x128xf32>
    %242 = arith.truncf %241 : vector<8x128xf32> to vector<8x128xbf16>
    %c0_52 = arith.constant 0 : index
    %c0_53 = arith.constant 0 : index
    %243 = vector.load %arg4[%c0_52, %c0_53] : memref<128x128xbf16, #tpu.memory_space<vmem>>, vector<128x128xbf16>
    %cst_54 = arith.constant dense<0.000000e+00> : vector<8x128xf32>
    %244 = tpu.matmul %242, %243, %cst_54 {dimension_numbers = #tpu.dot_dimension_numbers<[1], [0], [0], [1], [0, 0, 1, 1], [], []>} : vector<8x128xbf16>, vector<128x128xbf16>, vector<8x128xf32> -> vector<8x128xf32>
    %c0_55 = arith.constant 0 : index
    %c0_56 = arith.constant 0 : index
    %245 = vector.load %arg5[%c0_55, %c0_56] : memref<1x128xf32, #tpu.memory_space<vmem>>, vector<1x128xf32>
    %246 = vector.broadcast %245 : vector<1x128xf32> to vector<8x128xf32>
    %247 = arith.addf %244, %246 : vector<8x128xf32>
    %c0_57 = arith.constant 0 : index
    %c0_58 = arith.constant 0 : index
    %248 = vector.load %arg6[%c0_57, %c0_58] : memref<8x128xf32, #tpu.memory_space<vmem>>, vector<8x128xf32>
    tpu.vector_store %arg6[%c0_57, %c0_58], %247 {strides = array<i32>} : memref<8x128xf32, #tpu.memory_space<vmem>>, vector<8x128xf32>,
    return
  }
}

</mosaic_0001>

<bundles_post_ra>
// kernel: lstm_classifier_forward.1
= control target key start
LH: loop header
LB: loop body
LE: loop exit
PB: predicated region body
PF: predicated region fallthrough
CT: control target
= control target key end

     0   :  { %11 = vsyncpa [#allocation4], 0  ;;  %s3086_s0 = inlined_call_operand.vmem [shape: bf16[64,256], index: 0, kind: input, shape index: {}]   ;;  %s3087_s1 = inlined_call_operand.hbm [shape: bf16[256,512], index: 1, kind: input, shape index: {}]   ;;  %s3088_s2 = inlined_call_operand.hbm [shape: bf16[128,512], index: 2, kind: input, shape index: {}]   ;;  %s3089_s3 = inlined_call_operand.vmem [shape: f32[1,512], index: 3, kind: input, shape index: {}]   ;;  %s3090_s4 = inlined_call_operand.vmem [shape: bf16[128,128], index: 4, kind: input, shape index: {}]   ;;  %s3091_s5 = inlined_call_operand.vmem [shape: f32[1,128], index: 5, kind: input, shape index: {}]   ;;  %s3092_s6 = inlined_call_operand.vmem [shape: f32[8,128], index: 6, kind: output, shape index: {}]  }
   0x1   :  { %12 = vsyncpa [#allocation6], 0  ;;  %s2459_s21 = smov [#allocation3]   ;;  %s2411_s25 = scalar_lea.hbm %s3087_s1, 8192 }
   0x2   :  { %s20_s22 = sshll.u32 %s2459_s21, 4  ;;  %p2412_p0 = scmp.ne.s32.totalorder %s3087_s1, %s2411_s25  ;;  %s21_s22 = int_to_ptr.vmem [resolvable:$true] %s20_s22 }
   0x3   :  { %p2415_p1 = scmp.lt.u32.totalorder %s2411_s25, %s3087_s1 }
   0x5   :  { %p2417_p2 = pnand %p2415_p1, %p2412_p0 }
   0x7   :  { %2420 = shalt.err (!%p2417_p2)
}
   0x8   :  { %s2421_s30 = scalar_lea.vmem %s21_s22, 8192  ;;  %p2426_p4 = scmp.lt.s32.totalorder %s21_s22, %s21_s22 }
   0x9   :  { %p2422_p3 = scmp.ne.s32.totalorder %s21_s22, %s2421_s30  ;;  %p2427_p5 = scmp.lt.s32.totalorder %s2421_s30, %s2421_s30 }
   0xb   :  { %p2428_p6 = por %p2427_p5, %p2426_p4 }
   0xd   :  { %p2429_p7 = pnand %p2428_p6, %p2422_p3 }
   0xf   :  { %2432 = shalt.err (!%p2429_p7)
}
  0x10   :  { %s2460_s7 = smov 256   ;;  %s2461_s8 = smov 16  }
  0x11   :  { %26 = dma.hbm_to_vmem [thread:$0]  %s3087_s1, 8192, %s21_s22, [#allocation4], %s2460_s7, %s2460_s7, %s2461_s8  }
  0x12   :  { %s2462_s11 = smov [#allocation5]   ;;  %s2433_s15 = scalar_lea.hbm %s3088_s2, 4096 }
  0x13   :  { %s32_s12 = sshll.u32 %s2462_s11, 4  ;;  %p2434_p8 = scmp.ne.s32.totalorder %s3088_s2, %s2433_s15  ;;  %s33_s12 = int_to_ptr.vmem [resolvable:$true] %s32_s12 }
  0x14   :  { %p2437_p9 = scmp.lt.u32.totalorder %s2433_s15, %s3088_s2 }
  0x16   :  { %p2439_p10 = pnand %p2437_p9, %p2434_p8 }
  0x18   :  { %2442 = shalt.err (!%p2439_p10)
}
  0x19   :  { %s2443_s20 = scalar_lea.vmem %s33_s12, 4096  ;;  %p2448_p12 = scmp.lt.s32.totalorder %s33_s12, %s33_s12 }
  0x1a   :  { %p2444_p11 = scmp.ne.s32.totalorder %s33_s12, %s2443_s20  ;;  %p2449_p13 = scmp.lt.s32.totalorder %s2443_s20, %s2443_s20 }
  0x1c   :  { %p2450_p0 = por %p2449_p13, %p2448_p12 }
  0x1e   :  { %p2451_p1 = pnand %p2450_p0, %p2444_p11 }
  0x20   :  { %2454 = shalt.err (!%p2451_p1)
}
  0x21   :  { %38 = dma.hbm_to_vmem [thread:$0]  %s3088_s2, 4096, %s33_s12, [#allocation6], %s2460_s7, %s2460_s7, %s2461_s8  }
  0x22   :  { %2455 = dma.done.wait [#allocation4], 8192  }
  0x23   :  { %2456 = vsyncadd [#allocation4], 4294959104 }
  0x24   :  { %2457 = dma.done.wait [#allocation6], 4096  }
  0x25   :  { %2458 = vsyncadd [#allocation6], 4294963200  ;;  %v2087_v0 = vld [vmem:[#allocation3 + $0x4] ss:$16 sps:$4 sm:$0xff]   ;;  %v2089_v1 = vld [vmem:[#allocation3 + $0xc] ss:$16 sps:$4 sm:$0xff]  }
  0x26   :  { %506 = vmatprep.subr.bf16.mxu0 %v2087_v0  ;;  %v2091_v2 = vld [vmem:[#allocation3] ss:$16 sps:$4 sm:$0xff]   ;;  %v2092_v3 = vld [vmem:[#allocation3 + $0x8] ss:$16 sps:$4 sm:$0xff]   ;;  %579 = vmatprep.subr.bf16.mxu1 %v2089_v1  ;;  %v2093_v4 = vld [vmem:[#allocation3 + $0x24] ss:$16 sps:$4 sm:$0xff]  }
  0x27   :  { %507 = vmatpush1.bf16.msra.mxu0 %v2091_v2  ;;  %580 = vmatpush1.bf16.msra.mxu1 %v2092_v3  ;;  %v2095_v5 = vld [vmem:[#allocation3 + $0x2c] ss:$16 sps:$4 sm:$0xff]   ;;  %v2097_v6 = vld [vmem:[#allocation3 + $0x20] ss:$16 sps:$4 sm:$0xff]   ;;  %v2098_v7 = vld [vmem:[#allocation3 + $0x28] ss:$16 sps:$4 sm:$0xff]  }
  0x28   :  { %508 = vmatprep.subr.bf16.mxu0 %v2093_v4  ;;  %581 = vmatprep.subr.bf16.mxu1 %v2095_v5  ;;  %v2099_v8 = vld [vmem:[#allocation3 + $0x44] ss:$16 sps:$4 sm:$0xff]   ;;  %v2101_v9 = vld [vmem:[#allocation3 + $0x4c] ss:$16 sps:$4 sm:$0xff]   ;;  %v2103_v10 = vld [vmem:[#allocation3 + $0x40] ss:$16 sps:$4 sm:$0xff]  }
  0x29   :  { %v2104_v11 = vld [vmem:[#allocation3 + $0x48] ss:$16 sps:$4 sm:$0xff]   ;;  %v2105_v12 = vld [vmem:[#allocation3 + $0x64] ss:$16 sps:$4 sm:$0xff]   ;;  %v2107_v13 = vld [vmem:[#allocation3 + $0x6c] ss:$16 sps:$4 sm:$0xff]  }
  0x2a   :  { %v2109_v14 = vld [vmem:[#allocation3 + $0x60] ss:$16 sps:$4 sm:$0xff]   ;;  %v2110_v15 = vld [vmem:[#allocation3 + $0x68] ss:$16 sps:$4 sm:$0xff]   ;;  %v2111_v16 = vld [vmem:[#allocation3 + $0x84] ss:$16 sps:$4 sm:$0xff]  }
  0x2b   :  { %509 = vmatpush1.bf16.msra.mxu0 %v2097_v6  ;;  %582 = vmatpush1.bf16.msra.mxu1 %v2098_v7  ;;  %v2113_v17 = vld [vmem:[#allocation3 + $0x8c] ss:$16 sps:$4 sm:$0xff]   ;;  %v2115_v18 = vld [vmem:[#allocation3 + $0x80] ss:$16 sps:$4 sm:$0xff]   ;;  %v2116_v19 = vld [vmem:[#allocation3 + $0x88] ss:$16 sps:$4 sm:$0xff]  }
  0x2c   :  { %510 = vmatprep.subr.bf16.mxu0 %v2099_v8  ;;  %583 = vmatprep.subr.bf16.mxu1 %v2101_v9  ;;  %v2117_v20 = vld [vmem:[#allocation3 + $0xa4] ss:$16 sps:$4 sm:$0xff]   ;;  %v2119_v21 = vld [vmem:[#allocation3 + $0xac] ss:$16 sps:$4 sm:$0xff]   ;;  %v2121_v22 = vld [vmem:[#allocation3 + $0xa0] ss:$16 sps:$4 sm:$0xff]  }
  0x2d   :  { %v2122_v23 = vld [vmem:[#allocation3 + $0xa8] ss:$16 sps:$4 sm:$0xff]   ;;  %v2123_v24 = vld [vmem:[#allocation3 + $0xc4] ss:$16 sps:$4 sm:$0xff]   ;;  %v2125_v25 = vld [vmem:[#allocation3 + $0xcc] ss:$16 sps:$4 sm:$0xff]  }
  0x2e   :  { %v2127_v26 = vld [vmem:[#allocation3 + $0xc0] ss:$16 sps:$4 sm:$0xff]   ;;  %v2128_v27 = vld [vmem:[#allocation3 + $0xc8] ss:$16 sps:$4 sm:$0xff]   ;;  %v2129_v28 = vld [vmem:[#allocation3 + $0xe4] ss:$16 sps:$4 sm:$0xff]  }
  0x2f   :  { %511 = vmatpush1.bf16.msra.mxu0 %v2103_v10  ;;  %584 = vmatpush1.bf16.msra.mxu1 %v2104_v11  ;;  %v2131_v29 = vld [vmem:[#allocation3 + $0xec] ss:$16 sps:$4 sm:$0xff]   ;;  %v2133_v30 = vld [vmem:[#allocation3 + $0xe0] ss:$16 sps:$4 sm:$0xff]   ;;  %v2134_v31 = vld [vmem:[#allocation3 + $0xe8] ss:$16 sps:$4 sm:$0xff]  }
  0x30   :  { %512 = vmatprep.subr.bf16.mxu0 %v2105_v12  ;;  %585 = vmatprep.subr.bf16.mxu1 %v2107_v13  ;;  %v2135_v32 = vld [vmem:[#allocation3 + $0x104] ss:$16 sps:$4 sm:$0xff]   ;;  %v2137_v33 = vld [vmem:[#allocation3 + $0x10c] ss:$16 sps:$4 sm:$0xff]   ;;  %v2139_v34 = vld [vmem:[#allocation3 + $0x100] ss:$16 sps:$4 sm:$0xff]  }
  0x31   :  { %v2140_v35 = vld [vmem:[#allocation3 + $0x108] ss:$16 sps:$4 sm:$0xff]   ;;  %v2141_v36 = vld [vmem:[#allocation3 + $0x124] ss:$16 sps:$4 sm:$0xff]   ;;  %v2143_v37 = vld [vmem:[#allocation3 + $0x12c] ss:$16 sps:$4 sm:$0xff]  }
  0x32   :  { %v2145_v38 = vld [vmem:[#allocation3 + $0x120] ss:$16 sps:$4 sm:$0xff]   ;;  %v2146_v39 = vld [vmem:[#allocation3 + $0x128] ss:$16 sps:$4 sm:$0xff]   ;;  %v2147_v40 = vld [vmem:[#allocation3 + $0x144] ss:$16 sps:$4 sm:$0xff]  }
  0x33   :  { %513 = vmatpush1.bf16.msra.mxu0 %v2109_v14  ;;  %586 = vmatpush1.bf16.msra.mxu1 %v2110_v15  ;;  %v2149_v41 = vld [vmem:[#allocation3 + $0x14c] ss:$16 sps:$4 sm:$0xff]   ;;  %v2151_v42 = vld [vmem:[#allocation3 + $0x140] ss:$16 sps:$4 sm:$0xff]   ;;  %v2152_v43 = vld [vmem:[#allocation3 + $0x148] ss:$16 sps:$4 sm:$0xff]  }
  0x34   :  { %514 = vmatprep.subr.bf16.mxu0 %v2111_v16  ;;  %587 = vmatprep.subr.bf16.mxu1 %v2113_v17  ;;  %v2153_v44 = vld [vmem:[#allocation3 + $0x164] ss:$16 sps:$4 sm:$0xff]   ;;  %v2155_v45 = vld [vmem:[#allocation3 + $0x16c] ss:$16 sps:$4 sm:$0xff]   ;;  %v2157_v46 = vld [vmem:[#allocation3 + $0x160] ss:$16 sps:$4 sm:$0xff]  }
  0x35   :  { %v2158_v47 = vld [vmem:[#allocation3 + $0x168] ss:$16 sps:$4 sm:$0xff]   ;;  %v2185_v48 = vld [vmem:[%s3086_s0 + $0x4] ss:$8 sps:$4 sm:$0xff]   ;;  %v2163_v51 = vld [vmem:[#allocation3 + $0x180] ss:$16 sps:$4 sm:$0xff]  }
  0x36   :  { %v2159_v49 = vld [vmem:[#allocation3 + $0x184] ss:$16 sps:$4 sm:$0xff]   ;;  %v2161_v50 = vld [vmem:[#allocation3 + $0x18c] ss:$16 sps:$4 sm:$0xff]   ;;  %538 = vmatprep.mubr.bf16.mxu0 %v2185_v48  ;;  %611 = vmatprep.mubr.bf16.mxu1 %v2185_v48  ;;  %v2164_v52 = vld [vmem:[#allocation3 + $0x188] ss:$16 sps:$4 sm:$0xff]  }
  0x37   :  { %515 = vmatpush1.bf16.msra.mxu0 %v2115_v18  ;;  %588 = vmatpush1.bf16.msra.mxu1 %v2116_v19  ;;  %v2165_v53 = vld [vmem:[#allocation3 + $0x1a4] ss:$16 sps:$4 sm:$0xff]   ;;  %v2167_v54 = vld [vmem:[#allocation3 + $0x1ac] ss:$16 sps:$4 sm:$0xff]   ;;  %v2169_v55 = vld [vmem:[#allocation3 + $0x1a0] ss:$16 sps:$4 sm:$0xff]  }
  0x38   :  { %516 = vmatprep.subr.bf16.mxu0 %v2117_v20  ;;  %589 = vmatprep.subr.bf16.mxu1 %v2119_v21  ;;  %v2170_v56 = vld [vmem:[#allocation3 + $0x1a8] ss:$16 sps:$4 sm:$0xff]   ;;  %v2171_v57 = vld [vmem:[#allocation3 + $0x1c4] ss:$16 sps:$4 sm:$0xff]   ;;  %v2173_v58 = vld [vmem:[#allocation3 + $0x1cc] ss:$16 sps:$4 sm:$0xff]  }
  0x39   :  { %v2175_v59 = vld [vmem:[#allocation3 + $0x1c0] ss:$16 sps:$4 sm:$0xff]   ;;  %v2176_v60 = vld [vmem:[#allocation3 + $0x1c8] ss:$16 sps:$4 sm:$0xff]   ;;  %v2177_v61 = vld [vmem:[#allocation3 + $0x1e4] ss:$16 sps:$4 sm:$0xff]  }
  0x3a   :  { %v2179_v62 = vld [vmem:[#allocation3 + $0x1ec] ss:$16 sps:$4 sm:$0xff]   ;;  %v2181_v63 = vld [vmem:[#allocation3 + $0x1e0] ss:$16 sps:$4 sm:$0xff]   ;;  %v2182_v0 = vld [vmem:[#allocation3 + $0x1e8] ss:$16 sps:$4 sm:$0xff]  }
  0x3b   :  { %517 = vmatpush1.bf16.msra.mxu0 %v2121_v22  ;;  %590 = vmatpush1.bf16.msra.mxu1 %v2122_v23  ;;  %v2528_v1 = vld [vmem:[#allocation5 + $0x4] ss:$16 sps:$4 sm:$0xff]   ;;  %v2530_v2 = vld [vmem:[#allocation5 + $0xc] ss:$16 sps:$4 sm:$0xff]   ;;  %v2183_v3 = vld [vmem:[%s3086_s0] ss:$8 sps:$4 sm:$0xff]  }
  0x3c   :  { %518 = vmatprep.subr.bf16.mxu0 %v2123_v24  ;;  %591 = vmatprep.subr.bf16.mxu1 %v2125_v25  ;;  %v2535_v4 = vld [vmem:[#allocation5] ss:$16 sps:$4 sm:$0xff]   ;;  %v2537_v5 = vld [vmem:[#allocation5 + $0x8] ss:$16 sps:$4 sm:$0xff]   ;;  %v2539_v6 = vld [vmem:[#allocation5 + $0x24] ss:$16 sps:$4 sm:$0xff]  }
  0x3d   :  { %v2543_v7 = vld [vmem:[#allocation5 + $0x2c] ss:$16 sps:$4 sm:$0xff]   ;;  %v2550_v9 = vld [vmem:[#allocation5 + $0x20] ss:$16 sps:$4 sm:$0xff]   ;;  %v2552_v10 = vld [vmem:[#allocation5 + $0x28] ss:$16 sps:$4 sm:$0xff]  }
  0x3e   :  { %v2198_v8 = vld [vmem:[%s3086_s0 + $0x14] ss:$8 sps:$4 sm:$0xff]   ;;  %v2200_v11 = vld [vmem:[%s3086_s0 + $0x10] ss:$8 sps:$4 sm:$0xff]   ;;  %v2213_v18 = vld [vmem:[%s3086_s0 + $0x24] ss:$8 sps:$4 sm:$0xff]  }
  0x3f   :  { %519 = vmatpush1.bf16.msra.mxu0 %v2127_v26  ;;  %592 = vmatpush1.bf16.msra.mxu1 %v2128_v27  ;;  %v2559_v12 = vld [vmem:[#allocation5 + $0x44] ss:$16 sps:$4 sm:$0xff]   ;;  %v2561_v13 = vld [vmem:[#allocation5 + $0x4c] ss:$16 sps:$4 sm:$0xff]   ;;  %v2563_v14 = vld [vmem:[#allocation5 + $0x40] ss:$16 sps:$4 sm:$0xff]  }
  0x40   :  { %520 = vmatprep.subr.bf16.mxu0 %v2129_v28  ;;  %593 = vmatprep.subr.bf16.mxu1 %v2131_v29  ;;  %v2565_v15 = vld [vmem:[#allocation5 + $0x48] ss:$16 sps:$4 sm:$0xff]   ;;  %v2567_v16 = vld [vmem:[#allocation5 + $0x64] ss:$16 sps:$4 sm:$0xff]   ;;  %v2569_v17 = vld [vmem:[#allocation5 + $0x6c] ss:$16 sps:$4 sm:$0xff]  }
  0x41   :  { %v2580_v19 = vld [vmem:[#allocation5 + $0x60] ss:$16 sps:$4 sm:$0xff]   ;;  %v2582_v20 = vld [vmem:[#allocation5 + $0x68] ss:$16 sps:$4 sm:$0xff]   ;;  %v2586_v21 = vld [vmem:[#allocation5 + $0x84] ss:$16 sps:$4 sm:$0xff]  }
  0x42   :  { %v2588_v22 = vld [vmem:[#allocation5 + $0x8c] ss:$16 sps:$4 sm:$0xff]   ;;  %v2215_v23 = vld [vmem:[%s3086_s0 + $0x20] ss:$8 sps:$4 sm:$0xff]   ;;  %v2601_v26 = vld [vmem:[#allocation5 + $0xa4] ss:$16 sps:$4 sm:$0xff]  }
  0x43   :  { %521 = vmatpush1.bf16.msra.mxu0 %v2133_v30  ;;  %594 = vmatpush1.bf16.msra.mxu1 %v2134_v31  ;;  %v2595_v24 = vld [vmem:[#allocation5 + $0x80] ss:$16 sps:$4 sm:$0xff]   ;;  %v2597_v25 = vld [vmem:[#allocation5 + $0x88] ss:$16 sps:$4 sm:$0xff]   ;;  %v2603_v27 = vld [vmem:[#allocation5 + $0xac] ss:$16 sps:$4 sm:$0xff]  }
  0x44   :  { %522 = vmatprep.subr.bf16.mxu0 %v2135_v32  ;;  %595 = vmatprep.subr.bf16.mxu1 %v2137_v33  ;;  %v2228_v28 = vld [vmem:[%s3086_s0 + $0x34] ss:$8 sps:$4 sm:$0xff]   ;;  %v2610_v29 = vld [vmem:[#allocation5 + $0xa0] ss:$16 sps:$4 sm:$0xff]   ;;  %v2612_v30 = vld [vmem:[#allocation5 + $0xa8] ss:$16 sps:$4 sm:$0xff]  }
  0x45   :  { %v2616_v31 = vld [vmem:[#allocation5 + $0xc4] ss:$16 sps:$4 sm:$0xff]   ;;  %v2618_v32 = vld [vmem:[#allocation5 + $0xcc] ss:$16 sps:$4 sm:$0xff]   ;;  %v2230_v33 = vld [vmem:[%s3086_s0 + $0x30] ss:$8 sps:$4 sm:$0xff]  }
  0x46   :  { %vm2465_vm0 = vmmov 0  }
  0x47   :  { %523 = vmatpush1.bf16.msra.mxu0 %v2139_v34  ;;  %596 = vmatpush1.bf16.msra.mxu1 %v2140_v35  ;;  %v2625_v34 = vld [vmem:[#allocation5 + $0xc0] ss:$16 sps:$4 sm:$0xff]   ;;  %v2627_v35 = vld [vmem:[#allocation5 + $0xc8] ss:$16 sps:$4 sm:$0xff]  }
  0x48   :  { %524 = vmatprep.subr.bf16.mxu0 %v2141_v36  ;;  %597 = vmatprep.subr.bf16.mxu1 %v2143_v37  ;;  %v2631_v36 = vld [vmem:[#allocation5 + $0xe4] ss:$16 sps:$4 sm:$0xff]   ;;  %v2633_v37 = vld [vmem:[#allocation5 + $0xec] ss:$16 sps:$4 sm:$0xff]  }
  0x4b   :  { %525 = vmatpush1.bf16.msra.mxu0 %v2145_v38  ;;  %598 = vmatpush1.bf16.msra.mxu1 %v2146_v39  ;;  %v2637_v38 = vld [vmem:[#allocation5 + $0xe0] ss:$16 sps:$4 sm:$0xff]   ;;  %v2639_v39 = vld [vmem:[#allocation5 + $0xe8] ss:$16 sps:$4 sm:$0xff]  }
  0x4c   :  { %526 = vmatprep.subr.bf16.mxu0 %v2147_v40  ;;  %599 = vmatprep.subr.bf16.mxu1 %v2149_v41  ;;  %v3093_v40 = vmov 0   ;;  %v126_v41 = vlaneseq }
  0x4f   :  { %527 = vmatpush1.bf16.msra.mxu0 %v2151_v42  ;;  %600 = vmatpush1.bf16.msra.mxu1 %v2152_v43  ;;  %v127_v42 = vshrl.u32 %v126_v41, 7 }
  0x50   :  { %528 = vmatprep.subr.bf16.mxu0 %v2153_v44  ;;  %601 = vmatprep.subr.bf16.mxu1 %v2155_v45 }
  0x51   :  { %v136_v43 = vsub.s32 2, %v127_v42  ;;  %v140_v44 = vsub.s32 3, %v127_v42  ;;  %v128_v45 = vsub.s32 0, %v127_v42 }
  0x53   :  { %529 = vmatpush1.bf16.msra.mxu0 %v2157_v46  ;;  %602 = vmatpush1.bf16.msra.mxu1 %v2158_v47  ;;  %v124_v46 = vld [vmem:[%s3089_s3] sm:$0xf]  ;;  %v132_v47 = vsub.s32 1, %v127_v42 }
  0x54   :  { %530 = vmatprep.subr.bf16.mxu0 %v2159_v49  ;;  %603 = vmatprep.subr.bf16.mxu1 %v2161_v50  ;;  %v2688_v48 = vrot.slane %v124_v46, %v136_v43 }
  0x57   :  { %531 = vmatpush1.bf16.msra.mxu0 %v2163_v51  ;;  %604 = vmatpush1.bf16.msra.mxu1 %v2164_v52  ;;  %v2694_v51 = vrot.slane %v124_v46, %v140_v44  ;;  %v129_v52 = vrot.slane %v124_v46, %v128_v45 }
  0x58   :  { %532 = vmatprep.subr.bf16.mxu0 %v2165_v53  ;;  %605 = vmatprep.subr.bf16.mxu1 %v2167_v54 }
  0x5b   :  { %533 = vmatpush1.bf16.msra.mxu0 %v2169_v55  ;;  %606 = vmatpush1.bf16.msra.mxu1 %v2170_v56  ;;  %v133_v55 = vrot.slane %v124_v46, %v132_v47 }
  0x5c   :  { %534 = vmatprep.subr.bf16.mxu0 %v2171_v57  ;;  %607 = vmatprep.subr.bf16.mxu1 %v2173_v58 }
  0x5f   :  { %535 = vmatpush1.bf16.msra.mxu0 %v2175_v59  ;;  %608 = vmatpush1.bf16.msra.mxu1 %v2176_v60 }
  0x60   :  { %536 = vmatprep.subr.bf16.mxu0 %v2177_v61  ;;  %609 = vmatprep.subr.bf16.mxu1 %v2179_v62 }
  0x63   :  { %537 = vmatpush1.bf16.msra.mxu0 %v2181_v63  ;;  %610 = vmatpush1.bf16.msra.mxu1 %v2182_v0 }
  0x64   :  { %880 = vmatprep.subr.bf16.mxu0 %v2528_v1  ;;  %921 = vmatprep.subr.bf16.mxu1 %v2530_v2 }
  0x66   :  { %539 = vmatmul.mubr.bf16.vlgmr.msra.gmra.mrb[0].mxu0 %v2183_v3  ;;  %612 = vmatmul.mubr.bf16.vlgmr.msra.gmra.mrb[0].mxu1 %v2183_v3 }
  0x67   :  { %881 = vmatpush1.bf16.msra.mxu0 %v2535_v4  ;;  %922 = vmatpush1.bf16.msra.mxu1 %v2537_v5 }
  0x68   :  { %882 = vmatprep.subr.bf16.mxu0 %v2539_v6  ;;  %923 = vmatprep.subr.bf16.mxu1 %v2543_v7 }
  0x69   :  { %548 = vmatprep.mubr.bf16.mxu0 %v2198_v8  ;;  %621 = vmatprep.mubr.bf16.mxu1 %v2198_v8 }
  0x6b   :  { %883 = vmatpush1.bf16.msra.mxu0 %v2550_v9  ;;  %924 = vmatpush1.bf16.msra.mxu1 %v2552_v10 }
  0x6c   :  { %884 = vmatprep.subr.bf16.mxu0 %v2559_v12  ;;  %925 = vmatprep.subr.bf16.mxu1 %v2561_v13 }
  0x6e   :  { %549 = vmatmul.mubr.bf16.gmra.mrb[4].mxu0 %v2200_v11  ;;  %622 = vmatmul.mubr.bf16.gmra.mrb[4].mxu1 %v2200_v11 }
  0x6f   :  { %885 = vmatpush1.bf16.msra.mxu0 %v2563_v14  ;;  %926 = vmatpush1.bf16.msra.mxu1 %v2565_v15 }
  0x70   :  { %886 = vmatprep.subr.bf16.mxu0 %v2567_v16  ;;  %927 = vmatprep.subr.bf16.mxu1 %v2569_v17 }
  0x71   :  { %558 = vmatprep.mubr.bf16.mxu0 %v2213_v18  ;;  %631 = vmatprep.mubr.bf16.mxu1 %v2213_v18 }
  0x73   :  { %887 = vmatpush1.bf16.msra.mxu0 %v2580_v19  ;;  %928 = vmatpush1.bf16.msra.mxu1 %v2582_v20 }
  0x74   :  { %888 = vmatprep.subr.bf16.mxu0 %v2586_v21  ;;  %929 = vmatprep.subr.bf16.mxu1 %v2588_v22 }
  0x76   :  { %559 = vmatmul.mubr.bf16.gmra.mrb[8].mxu0 %v2215_v23  ;;  %632 = vmatmul.mubr.bf16.gmra.mrb[8].mxu1 %v2215_v23 }
  0x77   :  { %889 = vmatpush1.bf16.msra.mxu0 %v2595_v24  ;;  %930 = vmatpush1.bf16.msra.mxu1 %v2597_v25 }
  0x78   :  { %890 = vmatprep.subr.bf16.mxu0 %v2601_v26  ;;  %931 = vmatprep.subr.bf16.mxu1 %v2603_v27 }
  0x79   :  { %568 = vmatprep.mubr.bf16.mxu0 %v2228_v28  ;;  %641 = vmatprep.mubr.bf16.mxu1 %v2228_v28 }
  0x7b   :  { %891 = vmatpush1.bf16.msra.mxu0 %v2610_v29  ;;  %932 = vmatpush1.bf16.msra.mxu1 %v2612_v30 }
  0x7c   :  { %892 = vmatprep.subr.bf16.mxu0 %v2616_v31  ;;  %933 = vmatprep.subr.bf16.mxu1 %v2618_v32 }
  0x7e   :  { %569 = vmatmul.mubr.bf16.gmra.mrb[12].mxu0 %v2230_v33  ;;  %642 = vmatmul.mubr.bf16.gmra.mrb[12].mxu1 %v2230_v33 }
  0x7f   :  { %893 = vmatpush1.bf16.msra.mxu0 %v2625_v34  ;;  %934 = vmatpush1.bf16.msra.mxu1 %v2627_v35 }
  0x80   :  { %894 = vmatprep.subr.bf16.mxu0 %v2631_v36  ;;  %935 = vmatprep.subr.bf16.mxu1 %v2633_v37 }
  0x81   :  { %912 = vmatprep.mubr.bf16.mxu0 %v3093_v40  ;;  %953 = vmatprep.mubr.bf16.mxu1 %v3093_v40 }
  0x83   :  { %895 = vmatpush1.bf16.msra.mxu0 %v2637_v38  ;;  %936 = vmatpush1.bf16.msra.mxu1 %v2639_v39 }
  0x84   :  { %995 = vmatprep.subr.bf16.mxu0 %v2528_v1  ;;  %1036 = vmatprep.subr.bf16.mxu1 %v2530_v2 }
  0x86   :  { %913 = vmatmul.mubr.bf16.vlgmr.msra.gmra.mrb[16].mxu0 %v3093_v40  ;;  %954 = vmatmul.mubr.bf16.vlgmr.msra.gmra.mrb[16].mxu1 %v3093_v40 }
  0x87   :  { %996 = vmatpush1.bf16.msra.mxu0 %v2535_v4  ;;  %1037 = vmatpush1.bf16.msra.mxu1 %v2537_v5 }
  0x88   :  { %997 = vmatprep.subr.bf16.mxu0 %v2539_v6  ;;  %1038 = vmatprep.subr.bf16.mxu1 %v2543_v7 }
  0x89   :  { %1027 = vmatprep.mubr.bf16.mxu0 %v3093_v40  ;;  %1068 = vmatprep.mubr.bf16.mxu1 %v3093_v40 }
  0x8b   :  { %998 = vmatpush1.bf16.msra.mxu0 %v2550_v9  ;;  %1039 = vmatpush1.bf16.msra.mxu1 %v2552_v10 }
  0x8c   :  { %999 = vmatprep.subr.bf16.mxu0 %v2559_v12  ;;  %1040 = vmatprep.subr.bf16.mxu1 %v2561_v13 }
  0x8f   :  { %1000 = vmatpush1.bf16.msra.mxu0 %v2563_v14  ;;  %1041 = vmatpush1.bf16.msra.mxu1 %v2565_v15 }
  0x90   :  { %1001 = vmatprep.subr.bf16.mxu0 %v2567_v16  ;;  %1042 = vmatprep.subr.bf16.mxu1 %v2569_v17 }
  0x93   :  { %1002 = vmatpush1.bf16.msra.mxu0 %v2580_v19  ;;  %1043 = vmatpush1.bf16.msra.mxu1 %v2582_v20 }
  0x94   :  { %1003 = vmatprep.subr.bf16.mxu0 %v2586_v21  ;;  %1044 = vmatprep.subr.bf16.mxu1 %v2588_v22 }
  0x97   :  { %1004 = vmatpush1.bf16.msra.mxu0 %v2595_v24  ;;  %1045 = vmatpush1.bf16.msra.mxu1 %v2597_v25 }
  0x98   :  { %1005 = vmatprep.subr.bf16.mxu0 %v2601_v26  ;;  %1046 = vmatprep.subr.bf16.mxu1 %v2603_v27 }
  0x9b   :  { %1006 = vmatpush1.bf16.msra.mxu0 %v2610_v29  ;;  %1047 = vmatpush1.bf16.msra.mxu1 %v2612_v30 }
  0x9c   :  { %1007 = vmatprep.subr.bf16.mxu0 %v2616_v31  ;;  %1048 = vmatprep.subr.bf16.mxu1 %v2618_v32 }
  0x9f   :  { %1008 = vmatpush1.bf16.msra.mxu0 %v2625_v34  ;;  %1049 = vmatpush1.bf16.msra.mxu1 %v2627_v35 }
  0xa0   :  { %1009 = vmatprep.subr.bf16.mxu0 %v2631_v36  ;;  %1050 = vmatprep.subr.bf16.mxu1 %v2633_v37 }
  0xa3   :  { %1010 = vmatpush1.bf16.msra.mxu0 %v2637_v38  ;;  %1051 = vmatpush1.bf16.msra.mxu1 %v2639_v39 }
  0xa4   :  { %1110 = vmatprep.subr.bf16.mxu0 %v2528_v1  ;;  %1151 = vmatprep.subr.bf16.mxu1 %v2530_v2 }
 0x139   :  { %v2690_v49 = vpop.f32.mrb[0].mxu0  ;;  %v2692_v50 = vpop.f32.mrb[0].mxu1 }
 0x13a   :  { %v542_v53 = vpop.f32.mrb[1].mxu0  ;;  %v615_v54 = vpop.f32.mrb[1].mxu1 }
 0x13b   :  { %v544_v56 = vpop.f32.mrb[2].mxu0  ;;  %v617_v57 = vpop.f32.mrb[2].mxu1 }
 0x13c   :  { %v2696_v58 = vadd.f32 %v544_v56, %v129_v52  ;;  %v546_v59 = vpop.f32.mrb[3].mxu0  ;;  %v2699_v60 = vadd.f32 %v617_v57, %v2688_v48  ;;  %v619_v61 = vpop.f32.mrb[3].mxu1 }
 0x13d   :  { %v2701_v62 = vadd.f32 %v546_v59, %v133_v55  ;;  %v2704_v63 = vadd.f32 %v619_v61, %v2694_v51 }
 0x141   :  { %v550_v0 = vpop.f32.mrb[4].mxu0  ;;  %v623_v3 = vpop.f32.mrb[4].mxu1 }
 0x142   :  { %v2706_v8 = vadd.f32 %v550_v0, %v129_v52  ;;  %v552_v11 = vpop.f32.mrb[5].mxu0  ;;  %v2709_v18 = vadd.f32 %v623_v3, %v2688_v48  ;;  %v625_v23 = vpop.f32.mrb[5].mxu1 }
 0x143   :  { %v2711_v28 = vadd.f32 %v552_v11, %v133_v55  ;;  %v554_v33 = vpop.f32.mrb[6].mxu0  ;;  %v2714_v41 = vadd.f32 %v625_v23, %v2694_v51  ;;  %v627_v42 = vpop.f32.mrb[6].mxu1 }
 0x144   :  { %v2716_v43 = vadd.f32 %v554_v33, %v129_v52  ;;  %v556_v44 = vpop.f32.mrb[7].mxu0  ;;  %v2719_v45 = vadd.f32 %v627_v42, %v2688_v48  ;;  %v629_v46 = vpop.f32.mrb[7].mxu1 }
 0x145   :  { %3095 = vst [vmem:[#allocation9_spill] sm:$0xff] %v2714_v41  ;;  %v2721_v47 = vadd.f32 %v556_v44, %v133_v55  ;;  %v2724_v56 = vadd.f32 %v629_v46, %v2694_v51 }
 0x146   :  { %3096 = vst [vmem:[#allocation10_spill] sm:$0xff] %v2716_v43  ;;  %3097 = vst [vmem:[#allocation11_spill] sm:$0xff] %v2719_v45 }
 0x147   :  { %3098 = vst [vmem:[#allocation12_spill] sm:$0xff] %v2721_v47  ;;  %3099 = vst [vmem:[#allocation13_spill] sm:$0xff] %v2724_v56 }
 0x149   :  { %v560_v57 = vpop.f32.mrb[8].mxu0  ;;  %v633_v59 = vpop.f32.mrb[8].mxu1 }
 0x14a   :  { %v2726_v61 = vadd.f32 %v560_v57, %v129_v52  ;;  %v562_v0 = vpop.f32.mrb[9].mxu0  ;;  %v2729_v3 = vadd.f32 %v633_v59, %v2688_v48  ;;  %v635_v11 = vpop.f32.mrb[9].mxu1 }
 0x14b   :  { %v2731_v23 = vadd.f32 %v562_v0, %v133_v55  ;;  %v564_v33 = vpop.f32.mrb[10].mxu0  ;;  %v2734_v42 = vadd.f32 %v635_v11, %v2694_v51  ;;  %v637_v44 = vpop.f32.mrb[10].mxu1 }
 0x14c   :  { %3100 = vst [vmem:[#allocation14_spill] sm:$0xff] %v2726_v61  ;;  %3101 = vst [vmem:[#allocation15_spill] sm:$0xff] %v2729_v3  ;;  %v2736_v40 = vadd.f32 %v564_v33, %v129_v52  ;;  %v566_v46 = vpop.f32.mrb[11].mxu0  ;;  %v2739_v56 = vadd.f32 %v637_v44, %v2688_v48  ;;  %v639_v57 = vpop.f32.mrb[11].mxu1 }
 0x14d   :  { %3102 = vst [vmem:[#allocation16_spill] sm:$0xff] %v2731_v23  ;;  %3103 = vst [vmem:[#allocation17_spill] sm:$0xff] %v2734_v42  ;;  %v2741_v61 = vadd.f32 %v566_v46, %v133_v55  ;;  %v2744_v59 = vadd.f32 %v639_v57, %v2694_v51 }
 0x14e   :  { %3104 = vst [vmem:[#allocation18_spill] sm:$0xff] %v2736_v40  ;;  %3105 = vst [vmem:[#allocation19_spill] sm:$0xff] %v2739_v56 }
 0x14f   :  { %3106 = vst [vmem:[#allocation20_spill] sm:$0xff] %v2741_v61  ;;  %3107 = vst [vmem:[#allocation21_spill] sm:$0xff] %v2744_v59 }
 0x151   :  { %v570_v3 = vpop.f32.mrb[12].mxu0  ;;  %v643_v0 = vpop.f32.mrb[12].mxu1 }
 0x152   :  { %v2746_v23 = vadd.f32 %v570_v3, %v129_v52  ;;  %v572_v47 = vpop.f32.mrb[13].mxu0  ;;  %v2749_v11 = vadd.f32 %v643_v0, %v2688_v48  ;;  %v645_v33 = vpop.f32.mrb[13].mxu1 }
 0x153   :  { %v2751_v40 = vadd.f32 %v572_v47, %v133_v55  ;;  %v574_v42 = vpop.f32.mrb[14].mxu0  ;;  %v2754_v44 = vadd.f32 %v645_v33, %v2694_v51  ;;  %v647_v46 = vpop.f32.mrb[14].mxu1  ;;  %v541_v47 = vadd.f32 %v2690_v49, %v129_v52  ;;  %v543_v33 = vadd.f32 %v542_v53, %v133_v55 }
 0x154   :  { %3108 = vst [vmem:[#allocation22_spill] sm:$0xff] %v2746_v23  ;;  %3109 = vst [vmem:[#allocation23_spill] sm:$0xff] %v2749_v11  ;;  %v2756_v61 = vadd.f32 %v574_v42, %v129_v52  ;;  %v576_v57 = vpop.f32.mrb[15].mxu0  ;;  %v2759_v59 = vadd.f32 %v647_v46, %v2688_v48  ;;  %v649_v3 = vpop.f32.mrb[15].mxu1 }
 0x155   :  { %3110 = vst [vmem:[#allocation24_spill] sm:$0xff] %v2751_v40  ;;  %3111 = vst [vmem:[#allocation25_spill] sm:$0xff] %v2754_v44  ;;  %v2761_v23 = vadd.f32 %v576_v57, %v133_v55  ;;  %v2764_v0 = vadd.f32 %v649_v3, %v2694_v51  ;;  %v614_v40 = vadd.f32 %v2692_v50, %v2688_v48 }
 0x156   :  { %3112 = vst [vmem:[#allocation26_spill] sm:$0xff] %v2756_v61  ;;  %3113 = vst [vmem:[#allocation27_spill] sm:$0xff] %v2759_v59  ;;  %v616_v44 = vadd.f32 %v615_v54, %v2694_v51 }
 0x157   :  { %3114 = vst [vmem:[#allocation28_spill] sm:$0xff] %v2761_v23  ;;  %3115 = vst [vmem:[#allocation29_spill] sm:$0xff] %v2764_v0 }
 0x159   :  { %v914_v42 = vpop.f32.mrb[16].mxu0  ;;  %v955_v61 = vpop.f32.mrb[16].mxu1 }
 0x15a   :  { %v962_v11 = vadd.f32 %v914_v42, %v541_v47  ;;  %v964_v56 = vadd.f32 %v955_v61, %v614_v40  ;;  %v916_v46 = vpop.f32.mrb[17].mxu0  ;;  %v957_v59 = vpop.f32.mrb[17].mxu1 }
 0x15b   :  { %v963_v45 = vadd.f32 %v916_v46, %v543_v33  ;;  %v965_v57 = vadd.f32 %v957_v59, %v616_v44  ;;  %v918_v23 = vpop.f32.mrb[18].mxu0  ;;  %v959_v43 = vpop.f32.mrb[18].mxu1 }
 0x15c   :  { %v2018_v3 = vmul.f32 -1.442695, %v962_v11  ;;  %v919_v0 = vpop.f32.mrb[19].mxu0  ;;  %v960_v41 = vpop.f32.mrb[19].mxu1 }
 0x15d   :  { %v2019_v49 = vmul.f32 -1.442695, %v963_v45  ;;  %v2020_v48 = vmul.f32 -1.442695, %v965_v57 }
 0x15e   :  { %2251 = vpow2.f32 %v2018_v3 }
 0x15f   :  { %2253 = vpow2.f32 %v2019_v49 }
 0x160   :  { %2255 = vpow2.f32 %v2020_v48 }
 0x161   :  { %2257 = vtanh.f32 %v964_v56  ;;  %v3116_v56 = vmov 0  }
 0x168   :  { %v2252_v50 = vpop.eup %2251 }
 0x169   :  { %v2254_v52 = vpop.eup %2253  ;;  %v969_v51 = vadd.f32 1.0, %v2252_v50 }
 0x16a   :  { %v975_v53 = vadd.f32 1.0, %v2254_v52  ;;  %v2256_v40 = vpop.eup %2255 }
 0x16b   :  { %2259 = vrcp.f32 %v969_v51  ;;  %v2258_v54 = vpop.eup %2257  ;;  %v982_v23 = vadd.f32 1.0, %v2256_v40 }
 0x16c   :  { %2261 = vrcp.f32 %v975_v53 }
 0x16d   :  { %2263 = vrcp.f32 %v982_v23 }
 0x175   :  { %v2260_v55 = vpop.eup %2259 }
 0x176   :  { %v2262_v61 = vpop.eup %2261  ;;  %v986_v43 = vmul.f32 %v2260_v55, %v2258_v54 }
 0x177   :  { %v985_v59 = vmul.f32 0.0, %v2262_v61  ;;  %v2264_v45 = vpop.eup %2263 }
 0x179   :  { %v2770_v41 = vadd.f32 %v986_v43, %v985_v59 }
 0x17b   :  { %2265 = vtanh.f32 %v2770_v41 }
 0x185   :  { %v2266_v11 = vpop.eup %2265 }
 0x186   :  { %v989_v44 = vmul.f32 %v2266_v11, %v2264_v45 }
 0x188   :  { %v994_v0 = vpack.c.bf16 %v989_v44, %v989_v44 }
 0x18a   :  { %1028 = vmatmul.mubr.bf16.vlgmr.msra.gmra.mrb[20].mxu0 %v994_v0  ;;  %1069 = vmatmul.mubr.bf16.vlgmr.msra.gmra.mrb[20].mxu1 %v994_v0 }
 0x18b   :  { %1111 = vmatpush1.bf16.msra.mxu0 %v2535_v4  ;;  %1152 = vmatpush1.bf16.msra.mxu1 %v2537_v5 }
 0x18c   :  { %1112 = vmatprep.subr.bf16.mxu0 %v2539_v6  ;;  %1153 = vmatprep.subr.bf16.mxu1 %v2543_v7 }
 0x18d   :  { %1142 = vmatprep.mubr.bf16.mxu0 %v3116_v56  ;;  %1183 = vmatprep.mubr.bf16.mxu1 %v3116_v56 }
 0x18f   :  { %1113 = vmatpush1.bf16.msra.mxu0 %v2550_v9  ;;  %1154 = vmatpush1.bf16.msra.mxu1 %v2552_v10 }
 0x190   :  { %1114 = vmatprep.subr.bf16.mxu0 %v2559_v12  ;;  %1155 = vmatprep.subr.bf16.mxu1 %v2561_v13 }
 0x193   :  { %1115 = vmatpush1.bf16.msra.mxu0 %v2563_v14  ;;  %1156 = vmatpush1.bf16.msra.mxu1 %v2565_v15 }
 0x194   :  { %1116 = vmatprep.subr.bf16.mxu0 %v2567_v16  ;;  %1157 = vmatprep.subr.bf16.mxu1 %v2569_v17 }
 0x197   :  { %1117 = vmatpush1.bf16.msra.mxu0 %v2580_v19  ;;  %1158 = vmatpush1.bf16.msra.mxu1 %v2582_v20 }
 0x198   :  { %1118 = vmatprep.subr.bf16.mxu0 %v2586_v21  ;;  %1159 = vmatprep.subr.bf16.mxu1 %v2588_v22 }
 0x19b   :  { %1119 = vmatpush1.bf16.msra.mxu0 %v2595_v24  ;;  %1160 = vmatpush1.bf16.msra.mxu1 %v2597_v25 }
 0x19c   :  { %1120 = vmatprep.subr.bf16.mxu0 %v2601_v26  ;;  %1161 = vmatprep.subr.bf16.mxu1 %v2603_v27 }
 0x19f   :  { %1121 = vmatpush1.bf16.msra.mxu0 %v2610_v29  ;;  %1162 = vmatpush1.bf16.msra.mxu1 %v2612_v30 }
 0x1a0   :  { %1122 = vmatprep.subr.bf16.mxu0 %v2616_v31  ;;  %1163 = vmatprep.subr.bf16.mxu1 %v2618_v32 }
 0x1a3   :  { %1123 = vmatpush1.bf16.msra.mxu0 %v2625_v34  ;;  %1164 = vmatpush1.bf16.msra.mxu1 %v2627_v35 }
 0x1a4   :  { %1124 = vmatprep.subr.bf16.mxu0 %v2631_v36  ;;  %1165 = vmatprep.subr.bf16.mxu1 %v2633_v37 }
 0x1a7   :  { %1125 = vmatpush1.bf16.msra.mxu0 %v2637_v38  ;;  %1166 = vmatpush1.bf16.msra.mxu1 %v2639_v39 }
 0x1a8   :  { %1225 = vmatprep.subr.bf16.mxu0 %v2528_v1  ;;  %1266 = vmatprep.subr.bf16.mxu1 %v2530_v2 }
 0x25d   :  { %v1029_v47 = vpop.f32.mrb[20].mxu0  ;;  %v1070_v33 = vpop.f32.mrb[20].mxu1 }
 0x25e   :  { %v1077_v42 = vadd.f32 %v1029_v47, %v2696_v58  ;;  %v1079_v46 = vadd.f32 %v1070_v33, %v2699_v60  ;;  %v1031_v57 = vpop.f32.mrb[21].mxu0  ;;  %v1072_v3 = vpop.f32.mrb[21].mxu1 }
 0x25f   :  { %v1078_v49 = vadd.f32 %v1031_v57, %v2701_v62  ;;  %v1080_v48 = vadd.f32 %v1072_v3, %v2704_v63  ;;  %v1033_v50 = vpop.f32.mrb[22].mxu0  ;;  %v1074_v52 = vpop.f32.mrb[22].mxu1 }
 0x260   :  { %v2021_v51 = vmul.f32 -1.442695, %v1077_v42  ;;  %v1034_v53 = vpop.f32.mrb[23].mxu0  ;;  %v1075_v40 = vpop.f32.mrb[23].mxu1 }
 0x261   :  { %v2022_v54 = vmul.f32 -1.442695, %v1078_v49  ;;  %v2023_v55 = vmul.f32 -1.442695, %v1080_v48 }
 0x262   :  { %2267 = vpow2.f32 %v2021_v51  ;;  %v3117_v51 = vld [vmem:[#allocation9_spill] sm:$0xff] }
 0x263   :  { %2269 = vpow2.f32 %v2022_v54 }
 0x264   :  { %2271 = vpow2.f32 %v2023_v55 }
 0x265   :  { %2273 = vtanh.f32 %v1079_v46 }
 0x26c   :  { %v2268_v61 = vpop.eup %2267 }
 0x26d   :  { %v2270_v43 = vpop.eup %2269  ;;  %v1084_v58 = vadd.f32 1.0, %v2268_v61 }
 0x26e   :  { %v1090_v60 = vadd.f32 1.0, %v2270_v43  ;;  %v2272_v62 = vpop.eup %2271 }
 0x26f   :  { %2275 = vrcp.f32 %v1084_v58  ;;  %v2274_v23 = vpop.eup %2273  ;;  %v1097_v11 = vadd.f32 1.0, %v2272_v62 }
 0x270   :  { %2277 = vrcp.f32 %v1090_v60 }
 0x271   :  { %2279 = vrcp.f32 %v1097_v11 }
 0x279   :  { %v2276_v63 = vpop.eup %2275 }
 0x27a   :  { %v2278_v59 = vpop.eup %2277  ;;  %v1101_v45 = vmul.f32 %v2276_v63, %v2274_v23 }
 0x27b   :  { %v1100_v44 = vmul.f32 %v2278_v59, %v2770_v41  ;;  %v2280_v47 = vpop.eup %2279 }
 0x27d   :  { %v2812_v0 = vadd.f32 %v1101_v45, %v1100_v44 }
 0x27f   :  { %2281 = vtanh.f32 %v2812_v0 }
 0x289   :  { %v2282_v33 = vpop.eup %2281 }
 0x28a   :  { %v1104_v42 = vmul.f32 %v2282_v33, %v2280_v47 }
 0x28c   :  { %v1109_v46 = vpack.c.bf16 %v1104_v42, %v1104_v42 }
 0x28e   :  { %1143 = vmatmul.mubr.bf16.vlgmr.msra.gmra.mrb[24].mxu0 %v1109_v46  ;;  %1184 = vmatmul.mubr.bf16.vlgmr.msra.gmra.mrb[24].mxu1 %v1109_v46 }
 0x28f   :  { %1226 = vmatpush1.bf16.msra.mxu0 %v2535_v4  ;;  %1267 = vmatpush1.bf16.msra.mxu1 %v2537_v5 }
 0x290   :  { %1227 = vmatprep.subr.bf16.mxu0 %v2539_v6  ;;  %1268 = vmatprep.subr.bf16.mxu1 %v2543_v7 }
 0x291   :  { %1257 = vmatprep.mubr.bf16.mxu0 %v3116_v56  ;;  %1298 = vmatprep.mubr.bf16.mxu1 %v3116_v56 }
 0x293   :  { %1228 = vmatpush1.bf16.msra.mxu0 %v2550_v9  ;;  %1269 = vmatpush1.bf16.msra.mxu1 %v2552_v10 }
 0x294   :  { %1229 = vmatprep.subr.bf16.mxu0 %v2559_v12  ;;  %1270 = vmatprep.subr.bf16.mxu1 %v2561_v13 }
 0x297   :  { %1230 = vmatpush1.bf16.msra.mxu0 %v2563_v14  ;;  %1271 = vmatpush1.bf16.msra.mxu1 %v2565_v15 }
 0x298   :  { %1231 = vmatprep.subr.bf16.mxu0 %v2567_v16  ;;  %1272 = vmatprep.subr.bf16.mxu1 %v2569_v17 }
 0x29b   :  { %1232 = vmatpush1.bf16.msra.mxu0 %v2580_v19  ;;  %1273 = vmatpush1.bf16.msra.mxu1 %v2582_v20 }
 0x29c   :  { %1233 = vmatprep.subr.bf16.mxu0 %v2586_v21  ;;  %1274 = vmatprep.subr.bf16.mxu1 %v2588_v22 }
 0x29f   :  { %1234 = vmatpush1.bf16.msra.mxu0 %v2595_v24  ;;  %1275 = vmatpush1.bf16.msra.mxu1 %v2597_v25 }
 0x2a0   :  { %1235 = vmatprep.subr.bf16.mxu0 %v2601_v26  ;;  %1276 = vmatprep.subr.bf16.mxu1 %v2603_v27 }
 0x2a3   :  { %1236 = vmatpush1.bf16.msra.mxu0 %v2610_v29  ;;  %1277 = vmatpush1.bf16.msra.mxu1 %v2612_v30 }
 0x2a4   :  { %1237 = vmatprep.subr.bf16.mxu0 %v2616_v31  ;;  %1278 = vmatprep.subr.bf16.mxu1 %v2618_v32 }
 0x2a7   :  { %1238 = vmatpush1.bf16.msra.mxu0 %v2625_v34  ;;  %1279 = vmatpush1.bf16.msra.mxu1 %v2627_v35 }
 0x2a8   :  { %1239 = vmatprep.subr.bf16.mxu0 %v2631_v36  ;;  %1280 = vmatprep.subr.bf16.mxu1 %v2633_v37 }
 0x2ab   :  { %1240 = vmatpush1.bf16.msra.mxu0 %v2637_v38  ;;  %1281 = vmatpush1.bf16.msra.mxu1 %v2639_v39 }
 0x2ac   :  { %1340 = vmatprep.subr.bf16.mxu0 %v2528_v1  ;;  %1381 = vmatprep.subr.bf16.mxu1 %v2530_v2 }
 0x361   :  { %v1144_v41 = vpop.f32.mrb[24].mxu0  ;;  %v1185_v57 = vpop.f32.mrb[24].mxu1 }
 0x362   :  { %v1192_v3 = vadd.f32 %v1144_v41, %v2706_v8  ;;  %v1194_v49 = vadd.f32 %v1185_v57, %v2709_v18  ;;  %v1146_v48 = vpop.f32.mrb[25].mxu0  ;;  %v1187_v50 = vpop.f32.mrb[25].mxu1 }
 0x363   :  { %v1193_v52 = vadd.f32 %v1146_v48, %v2711_v28  ;;  %v1195_v53 = vadd.f32 %v1187_v50, %v3117_v51  ;;  %v1148_v40 = vpop.f32.mrb[26].mxu0  ;;  %v1189_v54 = vpop.f32.mrb[26].mxu1  ;;  %v3119_v50 = vld [vmem:[#allocation11_spill] sm:$0xff] }
 0x364   :  { %v2024_v55 = vmul.f32 -1.442695, %v1192_v3  ;;  %v1149_v61 = vpop.f32.mrb[27].mxu0  ;;  %v1190_v43 = vpop.f32.mrb[27].mxu1  ;;  %v3120_v40 = vld [vmem:[#allocation12_spill] sm:$0xff] }
 0x365   :  { %v2025_v58 = vmul.f32 -1.442695, %v1193_v52  ;;  %v2026_v60 = vmul.f32 -1.442695, %v1195_v53 }
 0x366   :  { %2283 = vpow2.f32 %v2024_v55  ;;  %v3121_v55 = vld [vmem:[#allocation13_spill] sm:$0xff] }
 0x367   :  { %2285 = vpow2.f32 %v2025_v58 }
 0x368   :  { %2287 = vpow2.f32 %v2026_v60 }
 0x369   :  { %2289 = vtanh.f32 %v1194_v49  ;;  %v3118_v49 = vld [vmem:[#allocation10_spill] sm:$0xff] }
 0x370   :  { %v2284_v62 = vpop.eup %2283 }
 0x371   :  { %v2286_v23 = vpop.eup %2285  ;;  %v1199_v8 = vadd.f32 1.0, %v2284_v62 }
 0x372   :  { %v1205_v18 = vadd.f32 1.0, %v2286_v23  ;;  %v2288_v28 = vpop.eup %2287 }
 0x373   :  { %2291 = vrcp.f32 %v1199_v8  ;;  %v2290_v63 = vpop.eup %2289  ;;  %v1212_v44 = vadd.f32 1.0, %v2288_v28 }
 0x374   :  { %2293 = vrcp.f32 %v1205_v18 }
 0x375   :  { %2295 = vrcp.f32 %v1212_v44 }
 0x37d   :  { %v2292_v59 = vpop.eup %2291 }
 0x37e   :  { %v2294_v45 = vpop.eup %2293  ;;  %v1216_v11 = vmul.f32 %v2292_v59, %v2290_v63 }
 0x37f   :  { %v1215_v47 = vmul.f32 %v2294_v45, %v2812_v0  ;;  %v2296_v42 = vpop.eup %2295 }
 0x381   :  { %v2854_v33 = vadd.f32 %v1216_v11, %v1215_v47 }
 0x383   :  { %2297 = vtanh.f32 %v2854_v33 }
 0x38d   :  { %v2298_v46 = vpop.eup %2297 }
 0x38e   :  { %v1219_v41 = vmul.f32 %v2298_v46, %v2296_v42 }
 0x390   :  { %v1224_v57 = vpack.c.bf16 %v1219_v41, %v1219_v41 }
 0x392   :  { %1258 = vmatmul.mubr.bf16.vlgmr.msra.gmra.mrb[28].mxu0 %v1224_v57  ;;  %1299 = vmatmul.mubr.bf16.vlgmr.msra.gmra.mrb[28].mxu1 %v1224_v57 }
 0x393   :  { %1341 = vmatpush1.bf16.msra.mxu0 %v2535_v4  ;;  %1382 = vmatpush1.bf16.msra.mxu1 %v2537_v5 }
 0x394   :  { %1342 = vmatprep.subr.bf16.mxu0 %v2539_v6  ;;  %1383 = vmatprep.subr.bf16.mxu1 %v2543_v7 }
 0x395   :  { %1372 = vmatprep.mubr.bf16.mxu0 %v3116_v56  ;;  %1413 = vmatprep.mubr.bf16.mxu1 %v3116_v56 }
 0x397   :  { %1343 = vmatpush1.bf16.msra.mxu0 %v2550_v9  ;;  %1384 = vmatpush1.bf16.msra.mxu1 %v2552_v10 }
 0x398   :  { %1344 = vmatprep.subr.bf16.mxu0 %v2559_v12  ;;  %1385 = vmatprep.subr.bf16.mxu1 %v2561_v13 }
 0x39b   :  { %1345 = vmatpush1.bf16.msra.mxu0 %v2563_v14  ;;  %1386 = vmatpush1.bf16.msra.mxu1 %v2565_v15 }
 0x39c   :  { %1346 = vmatprep.subr.bf16.mxu0 %v2567_v16  ;;  %1387 = vmatprep.subr.bf16.mxu1 %v2569_v17 }
 0x39f   :  { %1347 = vmatpush1.bf16.msra.mxu0 %v2580_v19  ;;  %1388 = vmatpush1.bf16.msra.mxu1 %v2582_v20 }
 0x3a0   :  { %1348 = vmatprep.subr.bf16.mxu0 %v2586_v21  ;;  %1389 = vmatprep.subr.bf16.mxu1 %v2588_v22 }
 0x3a3   :  { %1349 = vmatpush1.bf16.msra.mxu0 %v2595_v24  ;;  %1390 = vmatpush1.bf16.msra.mxu1 %v2597_v25 }
 0x3a4   :  { %1350 = vmatprep.subr.bf16.mxu0 %v2601_v26  ;;  %1391 = vmatprep.subr.bf16.mxu1 %v2603_v27 }
 0x3a7   :  { %1351 = vmatpush1.bf16.msra.mxu0 %v2610_v29  ;;  %1392 = vmatpush1.bf16.msra.mxu1 %v2612_v30 }
 0x3a8   :  { %1352 = vmatprep.subr.bf16.mxu0 %v2616_v31  ;;  %1393 = vmatprep.subr.bf16.mxu1 %v2618_v32 }
 0x3ab   :  { %1353 = vmatpush1.bf16.msra.mxu0 %v2625_v34  ;;  %1394 = vmatpush1.bf16.msra.mxu1 %v2627_v35 }
 0x3ac   :  { %1354 = vmatprep.subr.bf16.mxu0 %v2631_v36  ;;  %1395 = vmatprep.subr.bf16.mxu1 %v2633_v37 }
 0x3af   :  { %1355 = vmatpush1.bf16.msra.mxu0 %v2637_v38  ;;  %1396 = vmatpush1.bf16.msra.mxu1 %v2639_v39 }
 0x3b0   :  { %1455 = vmatprep.subr.bf16.mxu0 %v2528_v1  ;;  %1496 = vmatprep.subr.bf16.mxu1 %v2530_v2 }
 0x465   :  { %v1259_v0 = vpop.f32.mrb[28].mxu0  ;;  %v1300_v3 = vpop.f32.mrb[28].mxu1 }
 0x466   :  { %v1307_v48 = vadd.f32 %v1259_v0, %v3118_v49  ;;  %v1309_v52 = vadd.f32 %v1300_v3, %v3119_v50  ;;  %v1261_v51 = vpop.f32.mrb[29].mxu0  ;;  %v1302_v53 = vpop.f32.mrb[29].mxu1 }
 0x467   :  { %v1308_v54 = vadd.f32 %v1261_v51, %v3120_v40  ;;  %v1310_v61 = vadd.f32 %v1302_v53, %v3121_v55  ;;  %v1263_v43 = vpop.f32.mrb[30].mxu0  ;;  %v1304_v58 = vpop.f32.mrb[30].mxu1 }
 0x468   :  { %v2027_v60 = vmul.f32 -1.442695, %v1307_v48  ;;  %v1264_v62 = vpop.f32.mrb[31].mxu0  ;;  %v1305_v23 = vpop.f32.mrb[31].mxu1 }
 0x469   :  { %v2028_v1 = vmul.f32 -1.442695, %v1308_v54  ;;  %v2029_v2 = vmul.f32 -1.442695, %v1310_v61 }
 0x46a   :  { %2299 = vpow2.f32 %v2027_v60 }
 0x46b   :  { %2301 = vpow2.f32 %v2028_v1 }
 0x46c   :  { %2303 = vpow2.f32 %v2029_v2 }
 0x46d   :  { %2305 = vtanh.f32 %v1309_v52 }
 0x474   :  { %v2300_v8 = vpop.eup %2299 }
 0x475   :  { %v2302_v18 = vpop.eup %2301  ;;  %v1314_v28 = vadd.f32 1.0, %v2300_v8 }
 0x476   :  { %v1320_v63 = vadd.f32 1.0, %v2302_v18  ;;  %v2304_v59 = vpop.eup %2303 }
 0x477   :  { %2307 = vrcp.f32 %v1314_v28  ;;  %v2306_v45 = vpop.eup %2305  ;;  %v1327_v42 = vadd.f32 1.0, %v2304_v59  ;;  %v2945_v28 = vld [vmem:[#allocation5] ss:$16 sps:$4 sm:$0xff]   ;;  %v2951_v59 = vld [vmem:[#allocation5 + $0x24] ss:$16 sps:$4 sm:$0xff]  }
 0x478   :  { %2309 = vrcp.f32 %v1320_v63  ;;  %v2948_v63 = vld [vmem:[#allocation5 + $0x8] ss:$16 sps:$4 sm:$0xff]  }
 0x479   :  { %2311 = vrcp.f32 %v1327_v42  ;;  %v2968_v42 = vld [vmem:[#allocation5 + $0x4c] ss:$16 sps:$4 sm:$0xff]  }
 0x481   :  { %v2308_v11 = vpop.eup %2307 }
 0x482   :  { %v2310_v44 = vpop.eup %2309  ;;  %v1331_v47 = vmul.f32 %v2308_v11, %v2306_v45  ;;  %v2954_v45 = vld [vmem:[#allocation5 + $0x2c] ss:$16 sps:$4 sm:$0xff]   ;;  %v2959_v11 = vld [vmem:[#allocation5 + $0x20] ss:$16 sps:$4 sm:$0xff]  }
 0x483   :  { %v1330_v46 = vmul.f32 %v2310_v44, %v2854_v33  ;;  %v2312_v57 = vpop.eup %2311  ;;  %v2962_v44 = vld [vmem:[#allocation5 + $0x28] ss:$16 sps:$4 sm:$0xff]  }
 0x485   :  { %v2896_v41 = vadd.f32 %v1331_v47, %v1330_v46  ;;  %v2965_v47 = vld [vmem:[#allocation5 + $0x44] ss:$16 sps:$4 sm:$0xff]   ;;  %v2971_v46 = vld [vmem:[#allocation5 + $0x40] ss:$16 sps:$4 sm:$0xff]  }
 0x487   :  { %2313 = vtanh.f32 %v2896_v41 }
 0x491   :  { %v2314_v0 = vpop.eup %2313 }
 0x492   :  { %v1334_v3 = vmul.f32 %v2314_v0, %v2312_v57  ;;  %v2977_v57 = vld [vmem:[#allocation5 + $0x64] ss:$16 sps:$4 sm:$0xff]   ;;  %v2980_v0 = vld [vmem:[#allocation5 + $0x6c] ss:$16 sps:$4 sm:$0xff]  }
 0x494   :  { %v1339_v49 = vpack.c.bf16 %v1334_v3, %v1334_v3  ;;  %v2983_v3 = vld [vmem:[#allocation5 + $0x60] ss:$16 sps:$4 sm:$0xff]  }
 0x496   :  { %1373 = vmatmul.mubr.bf16.vlgmr.msra.gmra.mrb[32].mxu0 %v1339_v49  ;;  %1414 = vmatmul.mubr.bf16.vlgmr.msra.gmra.mrb[32].mxu1 %v1339_v49  ;;  %v2986_v49 = vld [vmem:[#allocation5 + $0x68] ss:$16 sps:$4 sm:$0xff]  }
 0x497   :  { %1456 = vmatpush1.bf16.msra.mxu0 %v2535_v4  ;;  %1497 = vmatpush1.bf16.msra.mxu1 %v2537_v5  ;;  %v2931_v4 = vld [vmem:[#allocation5 + $0x4] ss:$16 sps:$4 sm:$0xff]   ;;  %v2934_v5 = vld [vmem:[#allocation5 + $0xc] ss:$16 sps:$4 sm:$0xff]  }
 0x498   :  { %1457 = vmatprep.subr.bf16.mxu0 %v2539_v6  ;;  %1498 = vmatprep.subr.bf16.mxu1 %v2543_v7 }
 0x499   :  { %1487 = vmatprep.mubr.bf16.mxu0 %v3116_v56  ;;  %1528 = vmatprep.mubr.bf16.mxu1 %v3116_v56 }
 0x49b   :  { %1458 = vmatpush1.bf16.msra.mxu0 %v2550_v9  ;;  %1499 = vmatpush1.bf16.msra.mxu1 %v2552_v10  ;;  %v3122_v9 = vld [vmem:[#allocation14_spill] sm:$0xff] }
 0x49c   :  { %1459 = vmatprep.subr.bf16.mxu0 %v2559_v12  ;;  %1500 = vmatprep.subr.bf16.mxu1 %v2561_v13  ;;  %v3123_v12 = vld [vmem:[#allocation15_spill] sm:$0xff] }
 0x49f   :  { %1460 = vmatpush1.bf16.msra.mxu0 %v2563_v14  ;;  %1501 = vmatpush1.bf16.msra.mxu1 %v2565_v15 }
 0x4a0   :  { %1461 = vmatprep.subr.bf16.mxu0 %v2567_v16  ;;  %1502 = vmatprep.subr.bf16.mxu1 %v2569_v17  ;;  %v3124_v16 = vld [vmem:[#allocation16_spill] sm:$0xff] }
 0x4a3   :  { %1462 = vmatpush1.bf16.msra.mxu0 %v2580_v19  ;;  %1503 = vmatpush1.bf16.msra.mxu1 %v2582_v20  ;;  %v3125_v19 = vld [vmem:[#allocation17_spill] sm:$0xff] }
 0x4a4   :  { %1463 = vmatprep.subr.bf16.mxu0 %v2586_v21  ;;  %1504 = vmatprep.subr.bf16.mxu1 %v2588_v22 }
 0x4a7   :  { %1464 = vmatpush1.bf16.msra.mxu0 %v2595_v24  ;;  %1505 = vmatpush1.bf16.msra.mxu1 %v2597_v25 }
 0x4a8   :  { %1465 = vmatprep.subr.bf16.mxu0 %v2601_v26  ;;  %1506 = vmatprep.subr.bf16.mxu1 %v2603_v27 }
 0x4ab   :  { %1466 = vmatpush1.bf16.msra.mxu0 %v2610_v29  ;;  %1507 = vmatpush1.bf16.msra.mxu1 %v2612_v30 }
 0x4ac   :  { %1467 = vmatprep.subr.bf16.mxu0 %v2616_v31  ;;  %1508 = vmatprep.subr.bf16.mxu1 %v2618_v32 }
 0x4af   :  { %1468 = vmatpush1.bf16.msra.mxu0 %v2625_v34  ;;  %1509 = vmatpush1.bf16.msra.mxu1 %v2627_v35 }
 0x4b0   :  { %1469 = vmatprep.subr.bf16.mxu0 %v2631_v36  ;;  %1510 = vmatprep.subr.bf16.mxu1 %v2633_v37 }
 0x4b3   :  { %1470 = vmatpush1.bf16.msra.mxu0 %v2637_v38  ;;  %1511 = vmatpush1.bf16.msra.mxu1 %v2639_v39 }
 0x4b4   :  { %1570 = vmatprep.subr.bf16.mxu0 %v2931_v4  ;;  %1611 = vmatprep.subr.bf16.mxu1 %v2934_v5 }
 0x569   :  { %v1374_v6 = vpop.f32.mrb[32].mxu0  ;;  %v1415_v7 = vpop.f32.mrb[32].mxu1 }
 0x56a   :  { %v1422_v10 = vadd.f32 %v1374_v6, %v3122_v9  ;;  %v1424_v13 = vadd.f32 %v1415_v7, %v3123_v12  ;;  %v1376_v14 = vpop.f32.mrb[33].mxu0  ;;  %v1417_v15 = vpop.f32.mrb[33].mxu1  ;;  %v2989_v6 = vld [vmem:[#allocation5 + $0x84] ss:$16 sps:$4 sm:$0xff]   ;;  %v2992_v7 = vld [vmem:[#allocation5 + $0x8c] ss:$16 sps:$4 sm:$0xff]  }
 0x56b   :  { %v1423_v17 = vadd.f32 %v1376_v14, %v3124_v16  ;;  %v1425_v20 = vadd.f32 %v1417_v15, %v3125_v19  ;;  %v1378_v21 = vpop.f32.mrb[34].mxu0  ;;  %v1419_v22 = vpop.f32.mrb[34].mxu1  ;;  %v2995_v9 = vld [vmem:[#allocation5 + $0x80] ss:$16 sps:$4 sm:$0xff]   ;;  %v3128_v12 = vld [vmem:[#allocation20_spill] sm:$0xff] }
 0x56c   :  { %v2030_v24 = vmul.f32 -1.442695, %v1422_v10  ;;  %v1379_v25 = vpop.f32.mrb[35].mxu0  ;;  %v1420_v33 = vpop.f32.mrb[35].mxu1  ;;  %v2998_v10 = vld [vmem:[#allocation5 + $0x88] ss:$16 sps:$4 sm:$0xff]  }
 0x56d   :  { %v2031_v48 = vmul.f32 -1.442695, %v1423_v17  ;;  %v2032_v50 = vmul.f32 -1.442695, %v1425_v20 }
 0x56e   :  { %2315 = vpow2.f32 %v2030_v24 }
 0x56f   :  { %2317 = vpow2.f32 %v2031_v48 }
 0x570   :  { %2319 = vpow2.f32 %v2032_v50 }
 0x571   :  { %2321 = vtanh.f32 %v1424_v13  ;;  %v3129_v13 = vld [vmem:[#allocation21_spill] sm:$0xff] }
 0x578   :  { %v2316_v52 = vpop.eup %2315 }
 0x579   :  { %v2318_v51 = vpop.eup %2317  ;;  %v1429_v53 = vadd.f32 1.0, %v2316_v52 }
 0x57a   :  { %v1435_v40 = vadd.f32 1.0, %v2318_v51  ;;  %v2320_v54 = vpop.eup %2319 }
 0x57b   :  { %2323 = vrcp.f32 %v1429_v53  ;;  %v2322_v55 = vpop.eup %2321  ;;  %v1442_v60 = vadd.f32 1.0, %v2320_v54 }
 0x57c   :  { %2325 = vrcp.f32 %v1435_v40 }
 0x57d   :  { %2327 = vrcp.f32 %v1442_v60  ;;  %v2403_v60 = vld [vmem:[#allocation5 + $0xc4] ss:$16 sps:$4 sm:$0xff]  }
 0x585   :  { %v2324_v61 = vpop.eup %2323 }
 0x586   :  { %v2326_v43 = vpop.eup %2325  ;;  %v1446_v58 = vmul.f32 %v2324_v61, %v2322_v55  ;;  %v2400_v61 = vld [vmem:[#allocation5 + $0xac] ss:$16 sps:$4 sm:$0xff]  }
 0x587   :  { %v1445_v62 = vmul.f32 %v2326_v43, %v2896_v41  ;;  %v2328_v1 = vpop.eup %2327  ;;  %v2974_v41 = vld [vmem:[#allocation5 + $0x48] ss:$16 sps:$4 sm:$0xff]   ;;  %v2401_v43 = vld [vmem:[#allocation5 + $0xa0] ss:$16 sps:$4 sm:$0xff]  }
 0x589   :  { %v2942_v23 = vadd.f32 %v1446_v58, %v1445_v62  ;;  %v2402_v58 = vld [vmem:[#allocation5 + $0xa8] ss:$16 sps:$4 sm:$0xff]   ;;  %v2404_v62 = vld [vmem:[#allocation5 + $0xcc] ss:$16 sps:$4 sm:$0xff]  }
 0x58b   :  { %2329 = vtanh.f32 %v2942_v23 }
 0x595   :  { %v2330_v2 = vpop.eup %2329 }
 0x596   :  { %v1449_v8 = vmul.f32 %v2330_v2, %v2328_v1  ;;  %v2406_v1 = vld [vmem:[#allocation5 + $0xc8] ss:$16 sps:$4 sm:$0xff]   ;;  %v2407_v2 = vld [vmem:[#allocation5 + $0xe4] ss:$16 sps:$4 sm:$0xff]  }
 0x598   :  { %v1454_v18 = vpack.c.bf16 %v1449_v8, %v1449_v8  ;;  %v2408_v8 = vld [vmem:[#allocation5 + $0xec] ss:$16 sps:$4 sm:$0xff]  }
 0x59a   :  { %1488 = vmatmul.mubr.bf16.vlgmr.msra.gmra.mrb[36].mxu0 %v1454_v18  ;;  %1529 = vmatmul.mubr.bf16.vlgmr.msra.gmra.mrb[36].mxu1 %v1454_v18  ;;  %v2409_v18 = vld [vmem:[#allocation5 + $0xe0] ss:$16 sps:$4 sm:$0xff]  }
 0x59b   :  { %1571 = vmatpush1.bf16.msra.mxu0 %v2945_v28  ;;  %1612 = vmatpush1.bf16.msra.mxu1 %v2948_v63 }
 0x59c   :  { %1572 = vmatprep.subr.bf16.mxu0 %v2951_v59  ;;  %1613 = vmatprep.subr.bf16.mxu1 %v2954_v45 }
 0x59d   :  { %1602 = vmatprep.mubr.bf16.mxu0 %v3116_v56  ;;  %1643 = vmatprep.mubr.bf16.mxu1 %v3116_v56 }
 0x59f   :  { %1573 = vmatpush1.bf16.msra.mxu0 %v2959_v11  ;;  %1614 = vmatpush1.bf16.msra.mxu1 %v2962_v44 }
 0x5a0   :  { %1574 = vmatprep.subr.bf16.mxu0 %v2965_v47  ;;  %1615 = vmatprep.subr.bf16.mxu1 %v2968_v42 }
 0x5a3   :  { %1575 = vmatpush1.bf16.msra.mxu0 %v2971_v46  ;;  %1616 = vmatpush1.bf16.msra.mxu1 %v2974_v41 }
 0x5a4   :  { %1576 = vmatprep.subr.bf16.mxu0 %v2977_v57  ;;  %1617 = vmatprep.subr.bf16.mxu1 %v2980_v0 }
 0x5a7   :  { %1577 = vmatpush1.bf16.msra.mxu0 %v2983_v3  ;;  %1618 = vmatpush1.bf16.msra.mxu1 %v2986_v49 }
 0x5a8   :  { %1578 = vmatprep.subr.bf16.mxu0 %v2989_v6  ;;  %1619 = vmatprep.subr.bf16.mxu1 %v2992_v7 }
 0x5ab   :  { %1579 = vmatpush1.bf16.msra.mxu0 %v2995_v9  ;;  %1620 = vmatpush1.bf16.msra.mxu1 %v2998_v10 }
 0x5ac   :  { %1580 = vmatprep.subr.bf16.mxu0 %v2601_v26  ;;  %1621 = vmatprep.subr.bf16.mxu1 %v2603_v27 }
 0x5af   :  { %1581 = vmatpush1.bf16.msra.mxu0 %v2610_v29  ;;  %1622 = vmatpush1.bf16.msra.mxu1 %v2612_v30  ;;  %v3126_v29 = vld [vmem:[#allocation18_spill] sm:$0xff] }
 0x5b0   :  { %1582 = vmatprep.subr.bf16.mxu0 %v2616_v31  ;;  %1623 = vmatprep.subr.bf16.mxu1 %v2618_v32  ;;  %v3127_v31 = vld [vmem:[#allocation19_spill] sm:$0xff] }
 0x5b3   :  { %1583 = vmatpush1.bf16.msra.mxu0 %v2625_v34  ;;  %1624 = vmatpush1.bf16.msra.mxu1 %v2627_v35 }
 0x5b4   :  { %1584 = vmatprep.subr.bf16.mxu0 %v2631_v36  ;;  %1625 = vmatprep.subr.bf16.mxu1 %v2633_v37 }
 0x5b7   :  { %1585 = vmatpush1.bf16.msra.mxu0 %v2637_v38  ;;  %1626 = vmatpush1.bf16.msra.mxu1 %v2639_v39 }
 0x5b8   :  { %1685 = vmatprep.subr.bf16.mxu0 %v2931_v4  ;;  %1726 = vmatprep.subr.bf16.mxu1 %v2934_v5 }
 0x66d   :  { %v1489_v26 = vpop.f32.mrb[36].mxu0  ;;  %v1530_v27 = vpop.f32.mrb[36].mxu1 }
 0x66e   :  { %v1537_v30 = vadd.f32 %v1489_v26, %v3126_v29  ;;  %v1539_v32 = vadd.f32 %v1530_v27, %v3127_v31  ;;  %v1491_v34 = vpop.f32.mrb[37].mxu0  ;;  %v1532_v35 = vpop.f32.mrb[37].mxu1 }
 0x66f   :  { %v1538_v36 = vadd.f32 %v1491_v34, %v3128_v12  ;;  %v1540_v37 = vadd.f32 %v1532_v35, %v3129_v13  ;;  %v1493_v14 = vpop.f32.mrb[38].mxu0  ;;  %v1534_v38 = vpop.f32.mrb[38].mxu1 }
 0x670   :  { %v2033_v15 = vmul.f32 -1.442695, %v1537_v30  ;;  %v1494_v39 = vpop.f32.mrb[39].mxu0  ;;  %v1535_v16 = vpop.f32.mrb[39].mxu1 }
 0x671   :  { %v2034_v4 = vmul.f32 -1.442695, %v1538_v36  ;;  %v2035_v5 = vmul.f32 -1.442695, %v1540_v37 }
 0x672   :  { %2331 = vpow2.f32 %v2033_v15 }
 0x673   :  { %2333 = vpow2.f32 %v2034_v4 }
 0x674   :  { %2335 = vpow2.f32 %v2035_v5  ;;  %v2243_v5 = vld [vmem:[%s3090_s4] sm:$0xff]  }
 0x675   :  { %2337 = vtanh.f32 %v1539_v32 }
 0x67c   :  { %v2332_v17 = vpop.eup %2331 }
 0x67d   :  { %v2334_v19 = vpop.eup %2333  ;;  %v1544_v20 = vadd.f32 1.0, %v2332_v17  ;;  %v2464_v17 = vmov 0.0  }
 0x67e   :  { %v1550_v21 = vadd.f32 1.0, %v2334_v19  ;;  %v2336_v22 = vpop.eup %2335  ;;  %v2244_v19 = vld [vmem:[%s3090_s4 + $0x8] sm:$0xff]  }
 0x67f   :  { %2339 = vrcp.f32 %v1544_v20  ;;  %v2338_v24 = vpop.eup %2337  ;;  %v1557_v50 = vadd.f32 1.0, %v2336_v22  ;;  %v2245_v20 = vld [vmem:[%s3090_s4 + $0x10] sm:$0xff]   ;;  %v2247_v22 = vld [vmem:[%s3090_s4 + $0x20] sm:$0xff]  }
 0x680   :  { %2341 = vrcp.f32 %v1550_v21  ;;  %v2246_v21 = vld [vmem:[%s3090_s4 + $0x18] sm:$0xff]  }
 0x681   :  { %2343 = vrcp.f32 %v1557_v50 }
 0x689   :  { %v2340_v25 = vpop.eup %2339 }
 0x68a   :  { %v2342_v33 = vpop.eup %2341  ;;  %v1561_v48 = vmul.f32 %v2340_v25, %v2338_v24  ;;  %v2248_v24 = vld [vmem:[%s3090_s4 + $0x28] sm:$0xff]   ;;  %v2249_v25 = vld [vmem:[%s3090_s4 + $0x30] sm:$0xff]  }
 0x68b   :  { %v1560_v52 = vmul.f32 %v2342_v33, %v2942_v23  ;;  %v2344_v53 = vpop.eup %2343  ;;  %v2405_v23 = vld [vmem:[#allocation5 + $0xc0] ss:$16 sps:$4 sm:$0xff]   ;;  %v2250_v33 = vld [vmem:[%s3090_s4 + $0x38] sm:$0xff]  }
 0x68d   :  { %v3020_v51 = vadd.f32 %v1561_v48, %v1560_v52  ;;  %v3134_v52 = vld [vmem:[#allocation26_spill] sm:$0xff] }
 0x68f   :  { %2345 = vtanh.f32 %v3020_v51 }
 0x699   :  { %v2346_v40 = vpop.eup %2345 }
 0x69a   :  { %v1564_v54 = vmul.f32 %v2346_v40, %v2344_v53  ;;  %v3135_v53 = vld [vmem:[#allocation27_spill] sm:$0xff] }
 0x69c   :  { %v1569_v55 = vpack.c.bf16 %v1564_v54, %v1564_v54 }
 0x69e   :  { %1603 = vmatmul.mubr.bf16.vlgmr.msra.gmra.mrb[40].mxu0 %v1569_v55  ;;  %1644 = vmatmul.mubr.bf16.vlgmr.msra.gmra.mrb[40].mxu1 %v1569_v55 }
 0x69f   :  { %1686 = vmatpush1.bf16.msra.mxu0 %v2945_v28  ;;  %1727 = vmatpush1.bf16.msra.mxu1 %v2948_v63  ;;  %v2410_v28 = vld [vmem:[#allocation5 + $0xe8] ss:$16 sps:$4 sm:$0xff]  }
 0x6a0   :  { %1687 = vmatprep.subr.bf16.mxu0 %v2951_v59  ;;  %1728 = vmatprep.subr.bf16.mxu1 %v2954_v45  ;;  %v3130_v45 = vld [vmem:[#allocation22_spill] sm:$0xff] }
 0x6a1   :  { %1717 = vmatprep.mubr.bf16.mxu0 %v3116_v56  ;;  %1758 = vmatprep.mubr.bf16.mxu1 %v3116_v56  ;;  %v2399_v56 = vld [vmem:[#allocation5 + $0xa4] ss:$16 sps:$4 sm:$0xff]  }
 0x6a3   :  { %1688 = vmatpush1.bf16.msra.mxu0 %v2959_v11  ;;  %1729 = vmatpush1.bf16.msra.mxu1 %v2962_v44  ;;  %v3131_v44 = vld [vmem:[#allocation23_spill] sm:$0xff] }
 0x6a4   :  { %1689 = vmatprep.subr.bf16.mxu0 %v2965_v47  ;;  %1730 = vmatprep.subr.bf16.mxu1 %v2968_v42 }
 0x6a7   :  { %1690 = vmatpush1.bf16.msra.mxu0 %v2971_v46  ;;  %1731 = vmatpush1.bf16.msra.mxu1 %v2974_v41  ;;  %v3132_v41 = vld [vmem:[#allocation24_spill] sm:$0xff] }
 0x6a8   :  { %1691 = vmatprep.subr.bf16.mxu0 %v2977_v57  ;;  %1732 = vmatprep.subr.bf16.mxu1 %v2980_v0  ;;  %v3133_v0 = vld [vmem:[#allocation25_spill] sm:$0xff] }
 0x6ab   :  { %1692 = vmatpush1.bf16.msra.mxu0 %v2983_v3  ;;  %1733 = vmatpush1.bf16.msra.mxu1 %v2986_v49 }
 0x6ac   :  { %1693 = vmatprep.subr.bf16.mxu0 %v2989_v6  ;;  %1734 = vmatprep.subr.bf16.mxu1 %v2992_v7 }
 0x6af   :  { %1694 = vmatpush1.bf16.msra.mxu0 %v2995_v9  ;;  %1735 = vmatpush1.bf16.msra.mxu1 %v2998_v10 }
 0x6b0   :  { %1695 = vmatprep.subr.bf16.mxu0 %v2399_v56  ;;  %1736 = vmatprep.subr.bf16.mxu1 %v2400_v61  ;;  %v3136_v56 = vld [vmem:[#allocation28_spill] sm:$0xff] }
 0x6b3   :  { %1696 = vmatpush1.bf16.msra.mxu0 %v2401_v43  ;;  %1737 = vmatpush1.bf16.msra.mxu1 %v2402_v58  ;;  %v3137_v43 = vld [vmem:[#allocation29_spill] sm:$0xff] }
 0x6b4   :  { %1697 = vmatprep.subr.bf16.mxu0 %v2403_v60  ;;  %1738 = vmatprep.subr.bf16.mxu1 %v2404_v62 }
 0x6b7   :  { %1698 = vmatpush1.bf16.msra.mxu0 %v2405_v23  ;;  %1739 = vmatpush1.bf16.msra.mxu1 %v2406_v1 }
 0x6b8   :  { %1699 = vmatprep.subr.bf16.mxu0 %v2407_v2  ;;  %1740 = vmatprep.subr.bf16.mxu1 %v2408_v8 }
 0x6bb   :  { %1700 = vmatpush1.bf16.msra.mxu0 %v2409_v18  ;;  %1741 = vmatpush1.bf16.msra.mxu1 %v2410_v28 }
 0x6bc   :  { %2060 = vmatprep.subr.bf16.mxu0 %v2464_v17 }
 0x771   :  { %v1604_v63 = vpop.f32.mrb[40].mxu0  ;;  %v1645_v59 = vpop.f32.mrb[40].mxu1 }
 0x772   :  { %v1652_v11 = vadd.f32 %v1604_v63, %v3130_v45  ;;  %v1654_v47 = vadd.f32 %v1645_v59, %v3131_v44  ;;  %v1606_v42 = vpop.f32.mrb[41].mxu0  ;;  %v1647_v46 = vpop.f32.mrb[41].mxu1 }
 0x773   :  { %v1653_v57 = vadd.f32 %v1606_v42, %v3132_v41  ;;  %v1655_v3 = vadd.f32 %v1647_v46, %v3133_v0  ;;  %v1608_v49 = vpop.f32.mrb[42].mxu0  ;;  %v1649_v6 = vpop.f32.mrb[42].mxu1 }
 0x774   :  { %v2036_v7 = vmul.f32 -1.442695, %v1652_v11  ;;  %v1609_v9 = vpop.f32.mrb[43].mxu0  ;;  %v1650_v10 = vpop.f32.mrb[43].mxu1 }
 0x775   :  { %v2037_v26 = vmul.f32 -1.442695, %v1653_v57  ;;  %v2038_v27 = vmul.f32 -1.442695, %v1655_v3  ;;  %v2042_v9 = vld [vmem:[%s3091_s5] ss:$0 sm:$0xff] }
 0x776   :  { %2347 = vpow2.f32 %v2036_v7 }
 0x777   :  { %2349 = vpow2.f32 %v2037_v26 }
 0x778   :  { %2351 = vpow2.f32 %v2038_v27 }
 0x779   :  { %2353 = vtanh.f32 %v1654_v47 }
 0x780   :  { %v2348_v29 = vpop.eup %2347 }
 0x781   :  { %v2350_v30 = vpop.eup %2349  ;;  %v1659_v31 = vadd.f32 1.0, %v2348_v29 }
 0x782   :  { %v1665_v32 = vadd.f32 1.0, %v2350_v30  ;;  %v2352_v34 = vpop.eup %2351 }
 0x783   :  { %2355 = vrcp.f32 %v1659_v31  ;;  %v2354_v35 = vpop.eup %2353  ;;  %v1672_v37 = vadd.f32 1.0, %v2352_v34 }
 0x784   :  { %2357 = vrcp.f32 %v1665_v32 }
 0x785   :  { %2359 = vrcp.f32 %v1672_v37 }
 0x78d   :  { %v2356_v12 = vpop.eup %2355 }
 0x78e   :  { %v2358_v36 = vpop.eup %2357  ;;  %v1676_v13 = vmul.f32 %v2356_v12, %v2354_v35 }
 0x78f   :  { %v1675_v14 = vmul.f32 %v2358_v36, %v3020_v51  ;;  %v2360_v15 = vpop.eup %2359 }
 0x791   :  { %v3048_v38 = vadd.f32 %v1676_v13, %v1675_v14 }
 0x793   :  { %2361 = vtanh.f32 %v3048_v38 }
 0x79d   :  { %v2362_v39 = vpop.eup %2361 }
 0x79e   :  { %v1679_v16 = vmul.f32 %v2362_v39, %v2360_v15 }
 0x7a0   :  { %v1684_v4 = vpack.c.bf16 %v1679_v16, %v1679_v16 }
 0x7a2   :  { %1718 = vmatmul.mubr.bf16.vlgmr.msra.gmra.mrb[44].mxu0 %v1684_v4  ;;  %1759 = vmatmul.mubr.bf16.vlgmr.msra.gmra.mrb[44].mxu1 %v1684_v4 }
 0x7a3   :  { %2061 = vmatpush3.bf16.msra.mxu0 %v2243_v5  ;;  %2076 = vmatprep.mubr.msk.bf16.mxu0 %vm2465_vm0, %v2464_v17 }
 0x7a4   :  { %2062 = vmatprep.subr.bf16.mxu0 %v2464_v17 }
 0x7a7   :  { %2063 = vmatpush3.bf16.msra.mxu0 %v2244_v19 }
 0x7a8   :  { %2064 = vmatprep.subr.bf16.mxu0 %v2464_v17 }
 0x7ab   :  { %2065 = vmatpush3.bf16.msra.mxu0 %v2245_v20 }
 0x7ac   :  { %2066 = vmatprep.subr.bf16.mxu0 %v2464_v17 }
 0x7af   :  { %2067 = vmatpush3.bf16.msra.mxu0 %v2246_v21 }
 0x7b0   :  { %2068 = vmatprep.subr.bf16.mxu0 %v2464_v17 }
 0x7b3   :  { %2069 = vmatpush3.bf16.msra.mxu0 %v2247_v22 }
 0x7b4   :  { %2070 = vmatprep.subr.bf16.mxu0 %v2464_v17 }
 0x7b7   :  { %2071 = vmatpush3.bf16.msra.mxu0 %v2248_v24 }
 0x7b8   :  { %2072 = vmatprep.subr.bf16.mxu0 %v2464_v17 }
 0x7bb   :  { %2073 = vmatpush3.bf16.msra.mxu0 %v2249_v25 }
 0x7bc   :  { %2074 = vmatprep.subr.bf16.mxu0 %v2464_v17 }
 0x7bf   :  { %2075 = vmatpush3.bf16.msra.mxu0 %v2250_v33 }
 0x875   :  { %v1719_v48 = vpop.f32.mrb[44].mxu0  ;;  %v1760_v50 = vpop.f32.mrb[44].mxu1 }
 0x876   :  { %v1767_v51 = vadd.f32 %v1719_v48, %v3134_v52  ;;  %v1769_v40 = vadd.f32 %v1760_v50, %v3135_v53  ;;  %v1721_v54 = vpop.f32.mrb[45].mxu0  ;;  %v1762_v55 = vpop.f32.mrb[45].mxu1 }
 0x877   :  { %v1768_v61 = vadd.f32 %v1721_v54, %v3136_v56  ;;  %v1770_v58 = vadd.f32 %v1762_v55, %v3137_v43  ;;  %v1723_v60 = vpop.f32.mrb[46].mxu0  ;;  %v1764_v62 = vpop.f32.mrb[46].mxu1 }
 0x878   :  { %v2039_v23 = vmul.f32 -1.442695, %v1767_v51  ;;  %v1724_v1 = vpop.f32.mrb[47].mxu0  ;;  %v1765_v2 = vpop.f32.mrb[47].mxu1 }
 0x879   :  { %v2040_v8 = vmul.f32 -1.442695, %v1768_v61  ;;  %v2041_v18 = vmul.f32 -1.442695, %v1770_v58 }
 0x87a   :  { %2363 = vpow2.f32 %v2039_v23 }
 0x87b   :  { %2365 = vpow2.f32 %v2040_v8 }
 0x87c   :  { %2367 = vpow2.f32 %v2041_v18 }
 0x87d   :  { %2369 = vtanh.f32 %v1769_v40 }
 0x884   :  { %v2364_v28 = vpop.eup %2363 }
 0x885   :  { %v2366_v63 = vpop.eup %2365  ;;  %v1774_v59 = vadd.f32 1.0, %v2364_v28 }
 0x886   :  { %v1780_v45 = vadd.f32 1.0, %v2366_v63  ;;  %v2368_v11 = vpop.eup %2367 }
 0x887   :  { %2371 = vrcp.f32 %v1774_v59  ;;  %v2370_v44 = vpop.eup %2369  ;;  %v1787_v41 = vadd.f32 1.0, %v2368_v11 }
 0x888   :  { %2373 = vrcp.f32 %v1780_v45 }
 0x889   :  { %2375 = vrcp.f32 %v1787_v41 }
 0x891   :  { %v2372_v47 = vpop.eup %2371 }
 0x892   :  { %v2374_v42 = vpop.eup %2373  ;;  %v1791_v46 = vmul.f32 %v2372_v47, %v2370_v44 }
 0x893   :  { %v1790_v57 = vmul.f32 %v2374_v42, %v3048_v38  ;;  %v2376_v3 = vpop.eup %2375 }
 0x895   :  { %v1792_v0 = vadd.f32 %v1791_v46, %v1790_v57 }
 0x897   :  { %2377 = vtanh.f32 %v1792_v0 }
 0x8a1   :  { %v2378_v49 = vpop.eup %2377 }
 0x8a2   :  { %v1794_v6 = vmul.f32 %v2378_v49, %v2376_v3 }
 0x8a4   :  { %v1795_v7 = vpack.c.bf16 %v1794_v6, %v1794_v6 }
 0x8a6   :  { %2077 = vmatmul.mubr.bf16.vlgmr.msra.gmra.mrb[48].mxu0 %v1795_v7 }
 0x979   :  { %v1901_v10 = vpop.f32.mrb[48].mxu0 }
 0x97a   :  { %v1902_v26 = vadd.f32 %v2042_v9, %v1901_v10  ;;  %v2078_v27 = vpop.f32.mrb[49].mxu0 }
 0x97b   :  { %v1904_v29 = vpop.f32.mrb[50].mxu0 }
 0x97c   :  { %1907 = vst [vmem:[%s3092_s6] sm:$0xff] %v1902_v26  ;;  %v2079_v30 = vpop.f32.mrb[51].mxu0 }
 0x97d   :  { %1912 = vsyncpa [#allocation4], 1 }
 0x97e   :  { %1913 = vsyncpa [#allocation6], 1 }

</bundles_post_ra>
